<compile_context>
chip_gen: v6e
topology: v6e:2x2x1
jax: 0.10.0
libtpu: 0.0.40
codegen_flags: <defaults>
</compile_context>

<pallas_src>
import functools

import jax
import jax.numpy as jnp
from jax import lax
from jax.experimental import pallas as pl
from jax.experimental.pallas import tpu as pltpu

EPS = 1e-5  # GlobalLayerNorm epsilon


def _tcn_kernel(dilation, cconv_true,
                x_ref, aux_ref, alphas_ref,
                w1_ref, b1_ref, g1_ref, be1_ref,
                dw_ref, db_ref, g2_ref, be2_ref,
                w2_ref, b2_ref,
                o_ref):
    # x_ref: (Nb, T, Cin) — Nb samples per grid step, true (unpadded) Cin.
    nb, T, cin = x_ref.shape
    ccp = w1_ref.shape[1]
    rows = nb * T
    d = dilation
    inv_n = 1.0 / float(cconv_true * T)      # gLN uses the *true* channel count
    mm_dtype = w1_ref.dtype                  # weights pre-cast in the wrapper

    # ---- speaker embedding add; batch fused into the MXU M dimension ----
    y2 = (x_ref[...] + aux_ref[...]).reshape(rows, cin)

    # ---- 1x1 conv (pointwise) on the MXU ----
    h = jnp.dot(y2.astype(mm_dtype), w1_ref[...],
                preferred_element_type=jnp.float32) + b1_ref[...]   # (rows, Ccp) f32

    # ---- PReLU 1 (scalar slope from SMEM) ----
    a1 = alphas_ref[0]
    h = jnp.where(h >= 0, h, a1 * h)

    # ---- GlobalLayerNorm 1: fused sum/sumsq; h*scale + shift form ----
    # TODO(synk): single-pass E[x^2]-E[x]^2 loses precision when |mean| >> std;
    # subtract a per-sample shift before accumulating if inputs can be large.
    h3 = h.reshape(nb, T, ccp)
    s = jnp.sum(h3, axis=(1, 2), keepdims=True)
    ss = jnp.sum(h3 * h3, axis=(1, 2), keepdims=True)
    mean = s * inv_n
    var = jnp.maximum(ss * inv_n - mean * mean, 0.0)
    scale = g1_ref[...] * lax.rsqrt(var + EPS)           # (nb, 1, Ccp)
    shift = be1_ref[...] - mean * scale                  # (nb, 1, Ccp)
    h3 = h3 * scale + shift

    # ---- depthwise conv k=3, dilation=d, padding=d (same length) via XLU rolls ----
    # Roll along the flattened (Nb*T) sublane axis; iota masks re-impose per-sample
    # zero padding (and kill any cross-sample wraparound rows).
    h2 = h3.reshape(rows, ccp)
    hm = pltpu.roll(h2, shift=d % rows, axis=0).reshape(nb, T, ccp)            # h[t - d]
    hp = pltpu.roll(h2, shift=(rows - d) % rows, axis=0).reshape(nb, T, ccp)   # h[t + d]
    t_idx = lax.broadcasted_iota(jnp.int32, (nb, T, 1), 1)
    hm = jnp.where(t_idx >= d, hm, 0.0)
    hp = jnp.where(t_idx < T - d, hp, 0.0)
    dw = dw_ref[...]                                                           # (3, Ccp)
    h3 = dw[0:1] * hm + dw[1:2] * h3 + dw[2:3] * hp + db_ref[...]

    # ---- PReLU 2 ----
    a2 = alphas_ref[1]
    h3 = jnp.where(h3 >= 0, h3, a2 * h3)

    # ---- GlobalLayerNorm 2 ----
    s = jnp.sum(h3, axis=(1, 2), keepdims=True)
    ss = jnp.sum(h3 * h3, axis=(1, 2), keepdims=True)
    mean = s * inv_n
    var = jnp.maximum(ss * inv_n - mean * mean, 0.0)
    scale = g2_ref[...] * lax.rsqrt(var + EPS)
    shift = be2_ref[...] - mean * scale
    h3 = h3 * scale + shift

    # ---- sconv (pointwise back to Cin) + residual (x_ref re-read here) ----
    out = jnp.dot(h3.reshape(rows, ccp).astype(mm_dtype), w2_ref[...],
                  preferred_element_type=jnp.float32) + b2_ref[...]
    o_ref[...] = out.reshape(nb, T, cin) + x_ref[...]


def _round_up(n, m):
    return ((n + m - 1) // m) * m


def _vmem_budgets():
    """Generation-aware (temporaries budget, scoped vmem limit) in bytes."""
    try:
        cap = pltpu.get_tpu_info().vmem_capacity_bytes
    except Exception:
        cap = 64 * 1024 * 1024                       # unknown -> be conservative
    if cap >= 100 * 1024 * 1024:                     # v5e / v6e: 128 MiB per core
        return 64 * 1024 * 1024, 96 * 1024 * 1024
    return 22 * 1024 * 1024, 40 * 1024 * 1024        # v7x: 64 MiB per TensorCore


def _pick_batch_block(N, T, Cin, Ccp, budget):
    """How many samples to fuse into one grid step (batch rows packed into MXU M)."""
    if T % 8 != 0:
        # TODO(synk): pad T to a multiple of 8 in-kernel and mask the gLN sums /
        # final store instead of dropping batch fusion.
        return 1
    # Rough per-sample f32 working set: several (T, Ccp) temporaries plus the
    # double-buffered (T, Cin) input/output blocks.
    per_sample = 4 * T * (8 * Ccp + 4 * Cin)
    nb = max(1, min(N, budget // max(per_sample, 1)))
    nb = min(nb, max(1, 2048 // max(T, 1)))          # ~2K MXU rows is plenty
    if N >= 2:
        # Keep >=2 grid steps (one per v7x TensorCore) and >=4 when N permits so
        # the BlockSpec pipeline overlaps input/output DMA with compute.
        target_steps = 4 if N >= 8 else 2
        nb = min(nb, max(1, N // target_steps))
    while N % nb:
        nb -= 1
    return nb


def tcn_block_spk2(x_ntc, aux_nc, params, dilation, matmul_dtype=jnp.bfloat16):
    """x_ntc: (N, T, Cin), aux_nc: (N, Cin). Returns (N, T, Cin) f32."""
    N, T, Cin = x_ntc.shape
    Cconv = params["w1"].shape[1]
    Ccp = _round_up(Cconv, 128)
    pcc = Ccp - Cconv

    def padc(a, axis, amt):
        if not amt:
            return a
        return jnp.pad(a, [(0, amt if i == axis else 0) for i in range(a.ndim)])

    # Only the hidden (Cconv) dim of the small weight/param tensors is padded to a
    # lane multiple; activations keep the true Cin (no pad/crop HBM passes).
    # Padded channels stay identically zero because all padded per-channel params
    # are zero and the gLN denominator uses the true Cconv.
    w1 = padc(params["w1"], 1, pcc).astype(matmul_dtype)    # (Cin, Ccp)
    b1 = padc(params["b1"], 1, pcc).astype(jnp.float32)
    g1 = padc(params["g1"], 1, pcc).astype(jnp.float32)
    be1 = padc(params["be1"], 1, pcc).astype(jnp.float32)
    dw = padc(params["dw"], 1, pcc).astype(jnp.float32)     # (3, Ccp)
    db = padc(params["db"], 1, pcc).astype(jnp.float32)
    g2 = padc(params["g2"], 1, pcc).astype(jnp.float32)
    be2 = padc(params["be2"], 1, pcc).astype(jnp.float32)
    w2 = padc(params["w2"], 0, pcc).astype(matmul_dtype)    # (Ccp, Cin)
    b2 = params["b2"].astype(jnp.float32)                   # (1, Cin)
    alphas = jnp.concatenate(
        [params["a1"].reshape(-1), params["a2"].reshape(-1)]).astype(jnp.float32)  # (2,)

    x = x_ntc.astype(jnp.float32)
    aux = aux_nc.reshape(N, 1, Cin).astype(jnp.float32)

    budget, vmem_limit = _vmem_budgets()
    Nb = _pick_batch_block(N, T, Cin, Ccp, budget)
    kernel = functools.partial(_tcn_kernel, dilation, Cconv)

    def run(single_buffer_weights):
        if single_buffer_weights:
            # Constant-index weight tiles: single buffer — no point double-buffering
            # data that never changes across the grid (VMEM headroom on v7x).
            const = lambda shape: pl.BlockSpec(
                shape, lambda n: (0,) * len(shape), pipeline_mode=pl.Buffered(1))
        else:
            const = lambda shape: pl.BlockSpec(shape, lambda n: (0,) * len(shape))
        return pl.pallas_call(
            kernel,
            out_shape=jax.ShapeDtypeStruct((N, T, Cin), jnp.float32),
            grid_spec=pltpu.PrefetchScalarGridSpec(
                num_scalar_prefetch=0,
                grid=(N // Nb,),
                in_specs=[
                    pl.BlockSpec((Nb, T, Cin), lambda n: (n, 0, 0)),     # x
                    pl.BlockSpec((Nb, 1, Cin), lambda n: (n, 0, 0)),     # aux
                    pl.BlockSpec(memory_space=pltpu.MemorySpace.SMEM),   # PReLU slopes
                    const((Cin, Ccp)),                                   # w1
                    const((1, Ccp)),                                     # b1
                    const((1, Ccp)),                                     # gamma1
                    const((1, Ccp)),                                     # beta1
                    const((3, Ccp)),                                     # depthwise weights
                    const((1, Ccp)),                                     # depthwise bias
                    const((1, Ccp)),                                     # gamma2
                    const((1, Ccp)),                                     # beta2
                    const((Ccp, Cin)),                                   # w2
                    const((1, Cin)),                                     # b2
                ],
                out_specs=pl.BlockSpec((Nb, T, Cin), lambda n: (n, 0, 0)),
            ),
            compiler_params=pltpu.CompilerParams(
                dimension_semantics=("parallel",),
                vmem_limit_bytes=vmem_limit),
        )(x, aux, alphas, w1, b1, g1, be1, dw, db, g2, be2, w2, b2)

    try:
        return run(True)
    except Exception:
        # pl.Buffered(1) unsupported on this jax version — fall back to the
        # default double-buffered weight specs (known-good path).
        return run(False)


def reference_ncl(x_ncl, aux_nc, params, dilation):
    """Plain-JAX reference in PyTorch's NCL layout, mirroring the module."""
    N, Cin, T = x_ncl.shape
    w1 = params["w1"]          # (Cin, Cconv)
    y = x_ncl + aux_nc[:, :, None]
    y = jnp.einsum("co,nct->not", w1, y) + params["b1"].reshape(1, -1, 1)
    a1 = params["a1"][0, 0]
    y = jnp.where(y >= 0, y, a1 * y)
    mean = y.mean(axis=(1, 2), keepdims=True)
    var = ((y - mean) ** 2).mean(axis=(1, 2), keepdims=True)
    y = (params["g1"].reshape(1, -1, 1) * (y - mean) / jnp.sqrt(var + EPS)
         + params["be1"].reshape(1, -1, 1))
    d = dilation
    yp = jnp.pad(y, ((0, 0), (0, 0), (d, d)))
    dw = params["dw"]          # (3, Cconv)
    y = (dw[0].reshape(1, -1, 1) * yp[:, :, 0:T]
         + dw[1].reshape(1, -1, 1) * yp[:, :, d:d + T]
         + dw[2].reshape(1, -1, 1) * yp[:, :, 2 * d:2 * d + T]
         + params["db"].reshape(1, -1, 1))
    a2 = params["a2"][0, 0]
    y = jnp.where(y >= 0, y, a2 * y)
    mean = y.mean(axis=(1, 2), keepdims=True)
    var = ((y - mean) ** 2).mean(axis=(1, 2), keepdims=True)
    y = (params["g2"].reshape(1, -1, 1) * (y - mean) / jnp.sqrt(var + EPS)
         + params["be2"].reshape(1, -1, 1))
    y = jnp.einsum("co,nct->not", params["w2"], y) + params["b2"].reshape(1, -1, 1)
    return y + x_ncl


if __name__ == "__main__":
    # Small shapes consistent with the module: spk_embed_dim must equal in_channels
    # for `x + aux` broadcasting in TCNBlock_Spk2.forward.
    N, Cin, Cconv, T = 2, 64, 128, 16
    dilation = 2  # kernel_size=3, non-causal -> pad = dilation

    key = jax.random.PRNGKey(0)
    ks = jax.random.split(key, 16)

    def rnd(k, shape, scale=0.1):
        return (scale * jax.random.normal(k, shape)).astype(jnp.float32)

    params = {
        "w1": rnd(ks[0], (Cin, Cconv)),       # conv1x1 weight, (in, out) layout
        "b1": rnd(ks[1], (1, Cconv)),
        "a1": jnp.full((1, 1), 0.25, jnp.float32),   # PReLU1 slope (nn.PReLU default)
        "g1": 1.0 + rnd(ks[2], (1, Cconv)),   # gLN1 gamma
        "be1": rnd(ks[3], (1, Cconv)),        # gLN1 beta
        "dw": rnd(ks[4], (3, Cconv)),         # depthwise weights (K, Cconv)
        "db": rnd(ks[5], (1, Cconv)),
        "a2": jnp.full((1, 1), 0.25, jnp.float32),   # PReLU2 slope
        "g2": 1.0 + rnd(ks[6], (1, Cconv)),
        "be2": rnd(ks[7], (1, Cconv)),
        "w2": rnd(ks[8], (Cconv, Cin)),       # sconv weight, (in, out) layout
        "b2": rnd(ks[9], (1, Cin)),
    }

    x_ncl = rnd(ks[10], (N, Cin, T), scale=1.0)   # PyTorch layout [N, C_in, L]
    aux_nc = rnd(ks[11], (N, Cin), scale=1.0)     # speaker embedding [N, D], D == C_in

    ref = reference_ncl(x_ncl, aux_nc, params, dilation)

    # Pallas kernel works in NTC layout (transpose paid once per TCN stack).
    x_ntc = jnp.transpose(x_ncl, (0, 2, 1))

    # Exact (f32 MXU input) validation path: tight tolerance.
    out_f32 = jax.block_until_ready(
        tcn_block_spk2(x_ntc, aux_nc, params, dilation, matmul_dtype=jnp.float32))
    out_f32_ncl = jnp.transpose(out_f32, (0, 2, 1))
    assert out_f32_ncl.shape == (N, Cin, T)
    assert jnp.allclose(out_f32_ncl, ref, rtol=1e-4, atol=1e-4), "mismatch vs reference (f32)"

    # Default fast path: bf16 MXU inputs with f32 accumulation (looser tolerance).
    out_bf = jax.block_until_ready(tcn_block_spk2(x_ntc, aux_nc, params, dilation))
    out_bf_ncl = jnp.transpose(out_bf, (0, 2, 1))
    assert jnp.allclose(out_bf_ncl, ref, rtol=1e-1, atol=1e-1), "mismatch vs reference (bf16)"

    print("KERNEL_OK")
</pallas_src>

<mosaic_0001>
module attributes {stable_mosaic.version = 11 : i64} {
  func.func @_tcn_kernel(%arg0: i32, %arg1: memref<1x16x64xf32, #tpu.memory_space<vmem>>, %arg2: memref<1x1x64xf32, #tpu.memory_space<vmem>>, %arg3: memref<2xf32, #tpu.memory_space<smem>>, %arg4: memref<64x128xf32, #tpu.memory_space<vmem>>, %arg5: memref<1x128xf32, #tpu.memory_space<vmem>>, %arg6: memref<1x128xf32, #tpu.memory_space<vmem>>, %arg7: memref<1x128xf32, #tpu.memory_space<vmem>>, %arg8: memref<3x128xf32, #tpu.memory_space<vmem>>, %arg9: memref<1x128xf32, #tpu.memory_space<vmem>>, %arg10: memref<1x128xf32, #tpu.memory_space<vmem>>, %arg11: memref<1x128xf32, #tpu.memory_space<vmem>>, %arg12: memref<128x64xf32, #tpu.memory_space<vmem>>, %arg13: memref<1x64xf32, #tpu.memory_space<vmem>>, %arg14: memref<1x16x64xf32, #tpu.memory_space<vmem>>) attributes {dimension_semantics = [#tpu.dimension_semantics<parallel>], iteration_bounds = array<i64: 2>, scalar_prefetch = 0 : i64, scratch_operands = 0 : i64, tpu.core_type = #tpu.core_type<tc>, window_params = [{transform_indices = @transform_0, window_bounds = array<i64: 1, 16, 64>}, {transform_indices = @transform_1, window_bounds = array<i64: 1, 1, 64>}, {transform_indices = @transform_2, window_bounds = array<i64: 2>}, {pipeline_mode = #tpu.pipeline_mode<synchronous>, transform_indices = @transform_3, window_bounds = array<i64: 64, 128>}, {pipeline_mode = #tpu.pipeline_mode<synchronous>, transform_indices = @transform_4, window_bounds = array<i64: 1, 128>}, {pipeline_mode = #tpu.pipeline_mode<synchronous>, transform_indices = @transform_5, window_bounds = array<i64: 1, 128>}, {pipeline_mode = #tpu.pipeline_mode<synchronous>, transform_indices = @transform_6, window_bounds = array<i64: 1, 128>}, {pipeline_mode = #tpu.pipeline_mode<synchronous>, transform_indices = @transform_7, window_bounds = array<i64: 3, 128>}, {pipeline_mode = #tpu.pipeline_mode<synchronous>, transform_indices = @transform_8, window_bounds = array<i64: 1, 128>}, {pipeline_mode = #tpu.pipeline_mode<synchronous>, transform_indices = @transform_9, window_bounds = array<i64: 1, 128>}, {pipeline_mode = #tpu.pipeline_mode<synchronous>, transform_indices = @transform_10, window_bounds = array<i64: 1, 128>}, {pipeline_mode = #tpu.pipeline_mode<synchronous>, transform_indices = @transform_11, window_bounds = array<i64: 128, 64>}, {pipeline_mode = #tpu.pipeline_mode<synchronous>, transform_indices = @transform_12, window_bounds = array<i64: 1, 64>}, {transform_indices = @transform_13, window_bounds = array<i64: 1, 16, 64>}]} {
    %c0 = arith.constant 0 : index
    %c0_0 = arith.constant 0 : index
    %c0_1 = arith.constant 0 : index
    %0 = vector.load %arg1[%c0, %c0_0, %c0_1] : memref<1x16x64xf32, #tpu.memory_space<vmem>>, vector<1x16x64xf32>
    %c0_2 = arith.constant 0 : index
    %c0_3 = arith.constant 0 : index
    %c0_4 = arith.constant 0 : index
    %1 = vector.load %arg2[%c0_2, %c0_3, %c0_4] : memref<1x1x64xf32, #tpu.memory_space<vmem>>, vector<1x1x64xf32>
    %2 = vector.broadcast %1 : vector<1x1x64xf32> to vector<1x16x64xf32>
    %3 = arith.addf %0, %2 : vector<1x16x64xf32>
    %4 = vector.shape_cast %3 : vector<1x16x64xf32> to vector<16x64xf32>
    %c0_5 = arith.constant 0 : index
    %c0_6 = arith.constant 0 : index
    %5 = vector.load %arg4[%c0_5, %c0_6] : memref<64x128xf32, #tpu.memory_space<vmem>>, vector<64x128xf32>
    %cst = arith.constant dense<0.000000e+00> : vector<16x128xf32>
    %6 = tpu.matmul %4, %5, %cst {dimension_numbers = #tpu.dot_dimension_numbers<[1], [0], [0], [1], [0, 0, 1, 1], [], []>} : vector<16x64xf32>, vector<64x128xf32>, vector<16x128xf32> -> vector<16x128xf32>
    %c0_7 = arith.constant 0 : index
    %c0_8 = arith.constant 0 : index
    %7 = vector.load %arg5[%c0_7, %c0_8] : memref<1x128xf32, #tpu.memory_space<vmem>>, vector<1x128xf32>
    %8 = vector.broadcast %7 : vector<1x128xf32> to vector<16x128xf32>
    %9 = arith.addf %6, %8 : vector<16x128xf32>
    %c0_9 = arith.constant 0 : index
    %10 = memref.load %arg3[%c0_9] : memref<2xf32, #tpu.memory_space<smem>>
    %cst_10 = arith.constant 0.000000e+00 : f32
    %11 = vector.broadcast %cst_10 : f32 to vector<16x128xf32>
    %12 = arith.cmpf oge, %9, %11 : vector<16x128xf32>
    %13 = vector.broadcast %10 : f32 to vector<16x128xf32>
    %14 = arith.mulf %13, %9 : vector<16x128xf32>
    %15 = arith.select %12, %9, %14 : vector<16x128xi1>, vector<16x128xf32>
    %16 = vector.shape_cast %15 : vector<16x128xf32> to vector<1x16x128xf32>
    %cst_11 = arith.constant dense<0.000000e+00> : vector<1xf32>
    %17 = vector.multi_reduction <add>, %16, %cst_11 [1, 2] : vector<1x16x128xf32> to vector<1xf32>
    %18 = vector.shape_cast %17 : vector<1xf32> to vector<1x1x1xf32>
    %19 = arith.mulf %16, %16 : vector<1x16x128xf32>
    %cst_12 = arith.constant dense<0.000000e+00> : vector<1xf32>
    %20 = vector.multi_reduction <add>, %19, %cst_12 [1, 2] : vector<1x16x128xf32> to vector<1xf32>
    %21 = vector.shape_cast %20 : vector<1xf32> to vector<1x1x1xf32>
    %cst_13 = arith.constant 4.8828125E-4 : f32
    %22 = vector.broadcast %cst_13 : f32 to vector<1x1x1xf32>
    %23 = arith.mulf %18, %22 : vector<1x1x1xf32>
    %cst_14 = arith.constant 4.8828125E-4 : f32
    %24 = vector.broadcast %cst_14 : f32 to vector<1x1x1xf32>
    %25 = arith.mulf %21, %24 : vector<1x1x1xf32>
    %26 = arith.mulf %23, %23 : vector<1x1x1xf32>
    %27 = arith.subf %25, %26 : vector<1x1x1xf32>
    %cst_15 = arith.constant 0.000000e+00 : f32
    %28 = vector.broadcast %cst_15 : f32 to vector<1x1x1xf32>
    %29 = arith.maximumf %27, %28 : vector<1x1x1xf32>
    %c0_16 = arith.constant 0 : index
    %c0_17 = arith.constant 0 : index
    %30 = vector.load %arg6[%c0_16, %c0_17] : memref<1x128xf32, #tpu.memory_space<vmem>>, vector<1x128xf32>
    %cst_18 = arith.constant 9.99999974E-6 : f32
    %31 = vector.broadcast %cst_18 : f32 to vector<1x1x1xf32>
    %32 = arith.addf %29, %31 : vector<1x1x1xf32>
    %33 = math.rsqrt %32 : vector<1x1x1xf32>
    %34 = vector.shape_cast %30 : vector<1x128xf32> to vector<1x1x128xf32>
    %35 = vector.broadcast %33 : vector<1x1x1xf32> to vector<1x1x128xf32>
    %36 = arith.mulf %34, %35 : vector<1x1x128xf32>
    %c0_19 = arith.constant 0 : index
    %c0_20 = arith.constant 0 : index
    %37 = vector.load %arg7[%c0_19, %c0_20] : memref<1x128xf32, #tpu.memory_space<vmem>>, vector<1x128xf32>
    %38 = vector.broadcast %23 : vector<1x1x1xf32> to vector<1x1x128xf32>
    %39 = arith.mulf %38, %36 : vector<1x1x128xf32>
    %40 = vector.shape_cast %37 : vector<1x128xf32> to vector<1x1x128xf32>
    %41 = arith.subf %40, %39 : vector<1x1x128xf32>
    %42 = vector.broadcast %36 : vector<1x1x128xf32> to vector<1x16x128xf32>
    %43 = arith.mulf %16, %42 : vector<1x16x128xf32>
    %44 = vector.broadcast %41 : vector<1x1x128xf32> to vector<1x16x128xf32>
    %45 = arith.addf %43, %44 : vector<1x16x128xf32>
    %46 = vector.shape_cast %45 : vector<1x16x128xf32> to vector<16x128xf32>
    %c2_i32 = arith.constant 2 : i32
    %47 = tpu.dynamic_rotate %46 by %c2_i32 dim 0 : vector<16x128xf32>, i32 -> vector<16x128xf32>
    %48 = vector.shape_cast %47 : vector<16x128xf32> to vector<1x16x128xf32>
    %c14_i32 = arith.constant 14 : i32
    %49 = tpu.dynamic_rotate %46 by %c14_i32 dim 0 : vector<16x128xf32>, i32 -> vector<16x128xf32>
    %50 = vector.shape_cast %49 : vector<16x128xf32> to vector<1x16x128xf32>
    %51 = tpu.iota {dimensions = array<i32: 1>} : vector<1x16x1xi32>
    %c2_i32_21 = arith.constant 2 : i32
    %52 = vector.broadcast %c2_i32_21 : i32 to vector<1x16x1xi32>
    %53 = arith.cmpi sge, %51, %52 : vector<1x16x1xi32>
    %cst_22 = arith.constant 0.000000e+00 : f32
    %54 = vector.shape_cast %53 : vector<1x16x1xi1> to vector<1x16x1xi1>
    %55 = vector.broadcast %54 : vector<1x16x1xi1> to vector<1x16x128xi1>
    %56 = vector.broadcast %cst_22 : f32 to vector<1x16x128xf32>
    %57 = arith.select %55, %48, %56 : vector<1x16x128xi1>, vector<1x16x128xf32>
    %c14_i32_23 = arith.constant 14 : i32
    %58 = vector.broadcast %c14_i32_23 : i32 to vector<1x16x1xi32>
    %59 = arith.cmpi slt, %51, %58 : vector<1x16x1xi32>
    %cst_24 = arith.constant 0.000000e+00 : f32
    %60 = vector.shape_cast %59 : vector<1x16x1xi1> to vector<1x16x1xi1>
    %61 = vector.broadcast %60 : vector<1x16x1xi1> to vector<1x16x128xi1>
    %62 = vector.broadcast %cst_24 : f32 to vector<1x16x128xf32>
    %63 = arith.select %61, %50, %62 : vector<1x16x128xi1>, vector<1x16x128xf32>
    %c0_25 = arith.constant 0 : index
    %c0_26 = arith.constant 0 : index
    %64 = vector.load %arg8[%c0_25, %c0_26] : memref<3x128xf32, #tpu.memory_space<vmem>>, vector<3x128xf32>
    %65 = vector.extract_strided_slice %64 {offsets = [0, 0], sizes = [1, 128], strides = [1, 1]} : vector<3x128xf32> to vector<1x128xf32>
    %66 = vector.shape_cast %65 : vector<1x128xf32> to vector<1x1x128xf32>
    %67 = vector.broadcast %66 : vector<1x1x128xf32> to vector<1x16x128xf32>
    %68 = arith.mulf %67, %57 : vector<1x16x128xf32>
    %69 = vector.extract_strided_slice %64 {offsets = [1, 0], sizes = [1, 128], strides = [1, 1]} : vector<3x128xf32> to vector<1x128xf32>
    %70 = vector.shape_cast %69 : vector<1x128xf32> to vector<1x1x128xf32>
    %71 = vector.broadcast %70 : vector<1x1x128xf32> to vector<1x16x128xf32>
    %72 = arith.mulf %71, %45 : vector<1x16x128xf32>
    %73 = arith.addf %68, %72 : vector<1x16x128xf32>
    %74 = vector.extract_strided_slice %64 {offsets = [2, 0], sizes = [1, 128], strides = [1, 1]} : vector<3x128xf32> to vector<1x128xf32>
    %75 = vector.shape_cast %74 : vector<1x128xf32> to vector<1x1x128xf32>
    %76 = vector.broadcast %75 : vector<1x1x128xf32> to vector<1x16x128xf32>
    %77 = arith.mulf %76, %63 : vector<1x16x128xf32>
    %78 = arith.addf %73, %77 : vector<1x16x128xf32>
    %c0_27 = arith.constant 0 : index
    %c0_28 = arith.constant 0 : index
    %79 = vector.load %arg9[%c0_27, %c0_28] : memref<1x128xf32, #tpu.memory_space<vmem>>, vector<1x128xf32>
    %80 = vector.shape_cast %79 : vector<1x128xf32> to vector<1x1x128xf32>
    %81 = vector.broadcast %80 : vector<1x1x128xf32> to vector<1x16x128xf32>
    %82 = arith.addf %78, %81 : vector<1x16x128xf32>
    %c1 = arith.constant 1 : index
    %83 = memref.load %arg3[%c1] : memref<2xf32, #tpu.memory_space<smem>>
    %cst_29 = arith.constant 0.000000e+00 : f32
    %84 = vector.broadcast %cst_29 : f32 to vector<1x16x128xf32>
    %85 = arith.cmpf oge, %82, %84 : vector<1x16x128xf32>
    %86 = vector.broadcast %83 : f32 to vector<1x16x128xf32>
    %87 = arith.mulf %86, %82 : vector<1x16x128xf32>
    %88 = arith.select %85, %82, %87 : vector<1x16x128xi1>, vector<1x16x128xf32>
    %cst_30 = arith.constant dense<0.000000e+00> : vector<1xf32>
    %89 = vector.multi_reduction <add>, %88, %cst_30 [1, 2] : vector<1x16x128xf32> to vector<1xf32>
    %90 = vector.shape_cast %89 : vector<1xf32> to vector<1x1x1xf32>
    %91 = arith.mulf %88, %88 : vector<1x16x128xf32>
    %cst_31 = arith.constant dense<0.000000e+00> : vector<1xf32>
    %92 = vector.multi_reduction <add>, %91, %cst_31 [1, 2] : vector<1x16x128xf32> to vector<1xf32>
    %93 = vector.shape_cast %92 : vector<1xf32> to vector<1x1x1xf32>
    %cst_32 = arith.constant 4.8828125E-4 : f32
    %94 = vector.broadcast %cst_32 : f32 to vector<1x1x1xf32>
    %95 = arith.mulf %90, %94 : vector<1x1x1xf32>
    %cst_33 = arith.constant 4.8828125E-4 : f32
    %96 = vector.broadcast %cst_33 : f32 to vector<1x1x1xf32>
    %97 = arith.mulf %93, %96 : vector<1x1x1xf32>
    %98 = arith.mulf %95, %95 : vector<1x1x1xf32>
    %99 = arith.subf %97, %98 : vector<1x1x1xf32>
    %cst_34 = arith.constant 0.000000e+00 : f32
    %100 = vector.broadcast %cst_34 : f32 to vector<1x1x1xf32>
    %101 = arith.maximumf %99, %100 : vector<1x1x1xf32>
    %c0_35 = arith.constant 0 : index
    %c0_36 = arith.constant 0 : index
    %102 = vector.load %arg10[%c0_35, %c0_36] : memref<1x128xf32, #tpu.memory_space<vmem>>, vector<1x128xf32>
    %cst_37 = arith.constant 9.99999974E-6 : f32
    %103 = vector.broadcast %cst_37 : f32 to vector<1x1x1xf32>
    %104 = arith.addf %101, %103 : vector<1x1x1xf32>
    %105 = math.rsqrt %104 : vector<1x1x1xf32>
    %106 = vector.shape_cast %102 : vector<1x128xf32> to vector<1x1x128xf32>
    %107 = vector.broadcast %105 : vector<1x1x1xf32> to vector<1x1x128xf32>
    %108 = arith.mulf %106, %107 : vector<1x1x128xf32>
    %c0_38 = arith.constant 0 : index
    %c0_39 = arith.constant 0 : index
    %109 = vector.load %arg11[%c0_38, %c0_39] : memref<1x128xf32, #tpu.memory_space<vmem>>, vector<1x128xf32>
    %110 = vector.broadcast %95 : vector<1x1x1xf32> to vector<1x1x128xf32>
    %111 = arith.mulf %110, %108 : vector<1x1x128xf32>
    %112 = vector.shape_cast %109 : vector<1x128xf32> to vector<1x1x128xf32>
    %113 = arith.subf %112, %111 : vector<1x1x128xf32>
    %114 = vector.broadcast %108 : vector<1x1x128xf32> to vector<1x16x128xf32>
    %115 = arith.mulf %88, %114 : vector<1x16x128xf32>
    %116 = vector.broadcast %113 : vector<1x1x128xf32> to vector<1x16x128xf32>
    %117 = arith.addf %115, %116 : vector<1x16x128xf32>
    %118 = vector.shape_cast %117 : vector<1x16x128xf32> to vector<16x128xf32>
    %c0_40 = arith.constant 0 : index
    %c0_41 = arith.constant 0 : index
    %119 = vector.load %arg12[%c0_40, %c0_41] : memref<128x64xf32, #tpu.memory_space<vmem>>, vector<128x64xf32>
    %cst_42 = arith.constant dense<0.000000e+00> : vector<16x64xf32>
    %120 = tpu.matmul %118, %119, %cst_42 {dimension_numbers = #tpu.dot_dimension_numbers<[1], [0], [0], [1], [0, 0, 1, 1], [], []>} : vector<16x128xf32>, vector<128x64xf32>, vector<16x64xf32> -> vector<16x64xf32>
    %c0_43 = arith.constant 0 : index
    %c0_44 = arith.constant 0 : index
    %121 = vector.load %arg13[%c0_43, %c0_44] : memref<1x64xf32, #tpu.memory_space<vmem>>, vector<1x64xf32>
    %122 = vector.broadcast %121 : vector<1x64xf32> to vector<16x64xf32>
    %123 = arith.addf %120, %122 : vector<16x64xf32>
    %124 = vector.shape_cast %123 : vector<16x64xf32> to vector<1x16x64xf32>
    %c0_45 = arith.constant 0 : index
    %c0_46 = arith.constant 0 : index
    %c0_47 = arith.constant 0 : index
    %125 = vector.load %arg1[%c0_45, %c0_46, %c0_47] : memref<1x16x64xf32, #tpu.memory_space<vmem>>, vector<1x16x64xf32>
    %126 = arith.addf %124, %125 : vector<1x16x64xf32>
    %c0_48 = arith.constant 0 : index
    %c0_49 = arith.constant 0 : index
    %c0_50 = arith.constant 0 : index
    %127 = vector.load %arg14[%c0_48, %c0_49, %c0_50] : memref<1x16x64xf32, #tpu.memory_space<vmem>>, vector<1x16x64xf32>
    tpu.vector_store %arg14[%c0_48, %c0_49, %c0_50], %126 {strides = array<i32>} : memref<1x16x64xf32, #tpu.memory_space<vmem>>, vector<1x16x64xf32>,
    return
  }
  func.func @transform_0(%arg0: i32) -> (i32, i32, i32) {
    %c0_i32 = arith.constant 0 : i32
    %c0_i32_0 = arith.constant 0 : i32
    %c0_i32_1 = arith.constant 0 : i32
    return %arg0, %c0_i32, %c0_i32_0 : i32, i32, i32
  }
  func.func @transform_1(%arg0: i32) -> (i32, i32, i32) {
    %c0_i32 = arith.constant 0 : i32
    %c0_i32_0 = arith.constant 0 : i32
    %c0_i32_1 = arith.constant 0 : i32
    return %arg0, %c0_i32, %c0_i32_0 : i32, i32, i32
  }
  func.func @transform_2(%arg0: i32) -> i32 {
    %c0_i32 = arith.constant 0 : i32
    %c0_i32_0 = arith.constant 0 : i32
    return %c0_i32 : i32
  }
  func.func @transform_3(%arg0: i32) -> (i32, i32) {
    %c0_i32 = arith.constant 0 : i32
    %c0_i32_0 = arith.constant 0 : i32
    %c0_i32_1 = arith.constant 0 : i32
    return %c0_i32, %c0_i32_0 : i32, i32
  }
  func.func @transform_4(%arg0: i32) -> (i32, i32) {
    %c0_i32 = arith.constant 0 : i32
    %c0_i32_0 = arith.constant 0 : i32
    %c0_i32_1 = arith.constant 0 : i32
    return %c0_i32, %c0_i32_0 : i32, i32
  }
  func.func @transform_5(%arg0: i32) -> (i32, i32) {
    %c0_i32 = arith.constant 0 : i32
    %c0_i32_0 = arith.constant 0 : i32
    %c0_i32_1 = arith.constant 0 : i32
    return %c0_i32, %c0_i32_0 : i32, i32
  }
  func.func @transform_6(%arg0: i32) -> (i32, i32) {
    %c0_i32 = arith.constant 0 : i32
    %c0_i32_0 = arith.constant 0 : i32
    %c0_i32_1 = arith.constant 0 : i32
    return %c0_i32, %c0_i32_0 : i32, i32
  }
  func.func @transform_7(%arg0: i32) -> (i32, i32) {
    %c0_i32 = arith.constant 0 : i32
    %c0_i32_0 = arith.constant 0 : i32
    %c0_i32_1 = arith.constant 0 : i32
    return %c0_i32, %c0_i32_0 : i32, i32
  }
  func.func @transform_8(%arg0: i32) -> (i32, i32) {
    %c0_i32 = arith.constant 0 : i32
    %c0_i32_0 = arith.constant 0 : i32
    %c0_i32_1 = arith.constant 0 : i32
    return %c0_i32, %c0_i32_0 : i32, i32
  }
  func.func @transform_9(%arg0: i32) -> (i32, i32) {
    %c0_i32 = arith.constant 0 : i32
    %c0_i32_0 = arith.constant 0 : i32
    %c0_i32_1 = arith.constant 0 : i32
    return %c0_i32, %c0_i32_0 : i32, i32
  }
  func.func @transform_10(%arg0: i32) -> (i32, i32) {
    %c0_i32 = arith.constant 0 : i32
    %c0_i32_0 = arith.constant 0 : i32
    %c0_i32_1 = arith.constant 0 : i32
    return %c0_i32, %c0_i32_0 : i32, i32
  }
  func.func @transform_11(%arg0: i32) -> (i32, i32) {
    %c0_i32 = arith.constant 0 : i32
    %c0_i32_0 = arith.constant 0 : i32
    %c0_i32_1 = arith.constant 0 : i32
    return %c0_i32, %c0_i32_0 : i32, i32
  }
  func.func @transform_12(%arg0: i32) -> (i32, i32) {
    %c0_i32 = arith.constant 0 : i32
    %c0_i32_0 = arith.constant 0 : i32
    %c0_i32_1 = arith.constant 0 : i32
    return %c0_i32, %c0_i32_0 : i32, i32
  }
  func.func @transform_13(%arg0: i32) -> (i32, i32, i32) {
    %c0_i32 = arith.constant 0 : i32
    %c0_i32_0 = arith.constant 0 : i32
    %c0_i32_1 = arith.constant 0 : i32
    return %arg0, %c0_i32, %c0_i32_0 : i32, i32, i32
  }
}

module attributes {stable_mosaic.version = 11 : i64} {
  func.func @_tcn_kernel(%arg0: i32, %arg1: memref<1x16x64xf32, #tpu.memory_space<vmem>>, %arg2: memref<1x1x64xf32, #tpu.memory_space<vmem>>, %arg3: memref<2xf32, #tpu.memory_space<smem>>, %arg4: memref<64x128xf32, #tpu.memory_space<vmem>>, %arg5: memref<1x128xf32, #tpu.memory_space<vmem>>, %arg6: memref<1x128xf32, #tpu.memory_space<vmem>>, %arg7: memref<1x128xf32, #tpu.memory_space<vmem>>, %arg8: memref<3x128xf32, #tpu.memory_space<vmem>>, %arg9: memref<1x128xf32, #tpu.memory_space<vmem>>, %arg10: memref<1x128xf32, #tpu.memory_space<vmem>>, %arg11: memref<1x128xf32, #tpu.memory_space<vmem>>, %arg12: memref<128x64xf32, #tpu.memory_space<vmem>>, %arg13: memref<1x64xf32, #tpu.memory_space<vmem>>, %arg14: memref<1x16x64xf32, #tpu.memory_space<vmem>>) attributes {dimension_semantics = [#tpu.dimension_semantics<parallel>], iteration_bounds = array<i64: 2>, scalar_prefetch = 0 : i64, scratch_operands = 0 : i64, tpu.core_type = #tpu.core_type<tc>, window_params = [{transform_indices = @transform_0, window_bounds = array<i64: 1, 16, 64>}, {transform_indices = @transform_1, window_bounds = array<i64: 1, 1, 64>}, {transform_indices = @transform_2, window_bounds = array<i64: 2>}, {pipeline_mode = #tpu.pipeline_mode<synchronous>, transform_indices = @transform_3, window_bounds = array<i64: 64, 128>}, {pipeline_mode = #tpu.pipeline_mode<synchronous>, transform_indices = @transform_4, window_bounds = array<i64: 1, 128>}, {pipeline_mode = #tpu.pipeline_mode<synchronous>, transform_indices = @transform_5, window_bounds = array<i64: 1, 128>}, {pipeline_mode = #tpu.pipeline_mode<synchronous>, transform_indices = @transform_6, window_bounds = array<i64: 1, 128>}, {pipeline_mode = #tpu.pipeline_mode<synchronous>, transform_indices = @transform_7, window_bounds = array<i64: 3, 128>}, {pipeline_mode = #tpu.pipeline_mode<synchronous>, transform_indices = @transform_8, window_bounds = array<i64: 1, 128>}, {pipeline_mode = #tpu.pipeline_mode<synchronous>, transform_indices = @transform_9, window_bounds = array<i64: 1, 128>}, {pipeline_mode = #tpu.pipeline_mode<synchronous>, transform_indices = @transform_10, window_bounds = array<i64: 1, 128>}, {pipeline_mode = #tpu.pipeline_mode<synchronous>, transform_indices = @transform_11, window_bounds = array<i64: 128, 64>}, {pipeline_mode = #tpu.pipeline_mode<synchronous>, transform_indices = @transform_12, window_bounds = array<i64: 1, 64>}, {transform_indices = @transform_13, window_bounds = array<i64: 1, 16, 64>}]} {
    %c0 = arith.constant 0 : index
    %c0_0 = arith.constant 0 : index
    %c0_1 = arith.constant 0 : index
    %0 = vector.load %arg1[%c0, %c0_0, %c0_1] : memref<1x16x64xf32, #tpu.memory_space<vmem>>, vector<1x16x64xf32>
    %c0_2 = arith.constant 0 : index
    %c0_3 = arith.constant 0 : index
    %c0_4 = arith.constant 0 : index
    %1 = vector.load %arg2[%c0_2, %c0_3, %c0_4] : memref<1x1x64xf32, #tpu.memory_space<vmem>>, vector<1x1x64xf32>
    %2 = vector.broadcast %1 : vector<1x1x64xf32> to vector<1x16x64xf32>
    %3 = arith.addf %0, %2 : vector<1x16x64xf32>
    %4 = vector.shape_cast %3 : vector<1x16x64xf32> to vector<16x64xf32>
    %c0_5 = arith.constant 0 : index
    %c0_6 = arith.constant 0 : index
    %5 = vector.load %arg4[%c0_5, %c0_6] : memref<64x128xf32, #tpu.memory_space<vmem>>, vector<64x128xf32>
    %cst = arith.constant dense<0.000000e+00> : vector<16x128xf32>
    %6 = tpu.matmul %4, %5, %cst {dimension_numbers = #tpu.dot_dimension_numbers<[1], [0], [0], [1], [0, 0, 1, 1], [], []>} : vector<16x64xf32>, vector<64x128xf32>, vector<16x128xf32> -> vector<16x128xf32>
    %c0_7 = arith.constant 0 : index
    %c0_8 = arith.constant 0 : index
    %7 = vector.load %arg5[%c0_7, %c0_8] : memref<1x128xf32, #tpu.memory_space<vmem>>, vector<1x128xf32>
    %8 = vector.broadcast %7 : vector<1x128xf32> to vector<16x128xf32>
    %9 = arith.addf %6, %8 : vector<16x128xf32>
    %c0_9 = arith.constant 0 : index
    %10 = memref.load %arg3[%c0_9] : memref<2xf32, #tpu.memory_space<smem>>
    %cst_10 = arith.constant 0.000000e+00 : f32
    %11 = vector.broadcast %cst_10 : f32 to vector<16x128xf32>
    %12 = arith.cmpf oge, %9, %11 : vector<16x128xf32>
    %13 = vector.broadcast %10 : f32 to vector<16x128xf32>
    %14 = arith.mulf %13, %9 : vector<16x128xf32>
    %15 = arith.select %12, %9, %14 : vector<16x128xi1>, vector<16x128xf32>
    %16 = vector.shape_cast %15 : vector<16x128xf32> to vector<1x16x128xf32>
    %cst_11 = arith.constant dense<0.000000e+00> : vector<1xf32>
    %17 = vector.multi_reduction <add>, %16, %cst_11 [1, 2] : vector<1x16x128xf32> to vector<1xf32>
    %18 = vector.shape_cast %17 : vector<1xf32> to vector<1x1x1xf32>
    %19 = arith.mulf %16, %16 : vector<1x16x128xf32>
    %cst_12 = arith.constant dense<0.000000e+00> : vector<1xf32>
    %20 = vector.multi_reduction <add>, %19, %cst_12 [1, 2] : vector<1x16x128xf32> to vector<1xf32>
    %21 = vector.shape_cast %20 : vector<1xf32> to vector<1x1x1xf32>
    %cst_13 = arith.constant 4.8828125E-4 : f32
    %22 = vector.broadcast %cst_13 : f32 to vector<1x1x1xf32>
    %23 = arith.mulf %18, %22 : vector<1x1x1xf32>
    %cst_14 = arith.constant 4.8828125E-4 : f32
    %24 = vector.broadcast %cst_14 : f32 to vector<1x1x1xf32>
    %25 = arith.mulf %21, %24 : vector<1x1x1xf32>
    %26 = arith.mulf %23, %23 : vector<1x1x1xf32>
    %27 = arith.subf %25, %26 : vector<1x1x1xf32>
    %cst_15 = arith.constant 0.000000e+00 : f32
    %28 = vector.broadcast %cst_15 : f32 to vector<1x1x1xf32>
    %29 = arith.maximumf %27, %28 : vector<1x1x1xf32>
    %c0_16 = arith.constant 0 : index
    %c0_17 = arith.constant 0 : index
    %30 = vector.load %arg6[%c0_16, %c0_17] : memref<1x128xf32, #tpu.memory_space<vmem>>, vector<1x128xf32>
    %cst_18 = arith.constant 9.99999974E-6 : f32
    %31 = vector.broadcast %cst_18 : f32 to vector<1x1x1xf32>
    %32 = arith.addf %29, %31 : vector<1x1x1xf32>
    %33 = math.rsqrt %32 : vector<1x1x1xf32>
    %34 = vector.shape_cast %30 : vector<1x128xf32> to vector<1x1x128xf32>
    %35 = vector.broadcast %33 : vector<1x1x1xf32> to vector<1x1x128xf32>
    %36 = arith.mulf %34, %35 : vector<1x1x128xf32>
    %c0_19 = arith.constant 0 : index
    %c0_20 = arith.constant 0 : index
    %37 = vector.load %arg7[%c0_19, %c0_20] : memref<1x128xf32, #tpu.memory_space<vmem>>, vector<1x128xf32>
    %38 = vector.broadcast %23 : vector<1x1x1xf32> to vector<1x1x128xf32>
    %39 = arith.mulf %38, %36 : vector<1x1x128xf32>
    %40 = vector.shape_cast %37 : vector<1x128xf32> to vector<1x1x128xf32>
    %41 = arith.subf %40, %39 : vector<1x1x128xf32>
    %42 = vector.broadcast %36 : vector<1x1x128xf32> to vector<1x16x128xf32>
    %43 = arith.mulf %16, %42 : vector<1x16x128xf32>
    %44 = vector.broadcast %41 : vector<1x1x128xf32> to vector<1x16x128xf32>
    %45 = arith.addf %43, %44 : vector<1x16x128xf32>
    %46 = vector.shape_cast %45 : vector<1x16x128xf32> to vector<16x128xf32>
    %c2_i32 = arith.constant 2 : i32
    %47 = tpu.dynamic_rotate %46 by %c2_i32 dim 0 : vector<16x128xf32>, i32 -> vector<16x128xf32>
    %48 = vector.shape_cast %47 : vector<16x128xf32> to vector<1x16x128xf32>
    %c14_i32 = arith.constant 14 : i32
    %49 = tpu.dynamic_rotate %46 by %c14_i32 dim 0 : vector<16x128xf32>, i32 -> vector<16x128xf32>
    %50 = vector.shape_cast %49 : vector<16x128xf32> to vector<1x16x128xf32>
    %51 = tpu.iota {dimensions = array<i32: 1>} : vector<1x16x1xi32>
    %c2_i32_21 = arith.constant 2 : i32
    %52 = vector.broadcast %c2_i32_21 : i32 to vector<1x16x1xi32>
    %53 = arith.cmpi sge, %51, %52 : vector<1x16x1xi32>
    %cst_22 = arith.constant 0.000000e+00 : f32
    %54 = vector.shape_cast %53 : vector<1x16x1xi1> to vector<1x16x1xi1>
    %55 = vector.broadcast %54 : vector<1x16x1xi1> to vector<1x16x128xi1>
    %56 = vector.broadcast %cst_22 : f32 to vector<1x16x128xf32>
    %57 = arith.select %55, %48, %56 : vector<1x16x128xi1>, vector<1x16x128xf32>
    %c14_i32_23 = arith.constant 14 : i32
    %58 = vector.broadcast %c14_i32_23 : i32 to vector<1x16x1xi32>
    %59 = arith.cmpi slt, %51, %58 : vector<1x16x1xi32>
    %cst_24 = arith.constant 0.000000e+00 : f32
    %60 = vector.shape_cast %59 : vector<1x16x1xi1> to vector<1x16x1xi1>
    %61 = vector.broadcast %60 : vector<1x16x1xi1> to vector<1x16x128xi1>
    %62 = vector.broadcast %cst_24 : f32 to vector<1x16x128xf32>
    %63 = arith.select %61, %50, %62 : vector<1x16x128xi1>, vector<1x16x128xf32>
    %c0_25 = arith.constant 0 : index
    %c0_26 = arith.constant 0 : index
    %64 = vector.load %arg8[%c0_25, %c0_26] : memref<3x128xf32, #tpu.memory_space<vmem>>, vector<3x128xf32>
    %65 = vector.extract_strided_slice %64 {offsets = [0, 0], sizes = [1, 128], strides = [1, 1]} : vector<3x128xf32> to vector<1x128xf32>
    %66 = vector.shape_cast %65 : vector<1x128xf32> to vector<1x1x128xf32>
    %67 = vector.broadcast %66 : vector<1x1x128xf32> to vector<1x16x128xf32>
    %68 = arith.mulf %67, %57 : vector<1x16x128xf32>
    %69 = vector.extract_strided_slice %64 {offsets = [1, 0], sizes = [1, 128], strides = [1, 1]} : vector<3x128xf32> to vector<1x128xf32>
    %70 = vector.shape_cast %69 : vector<1x128xf32> to vector<1x1x128xf32>
    %71 = vector.broadcast %70 : vector<1x1x128xf32> to vector<1x16x128xf32>
    %72 = arith.mulf %71, %45 : vector<1x16x128xf32>
    %73 = arith.addf %68, %72 : vector<1x16x128xf32>
    %74 = vector.extract_strided_slice %64 {offsets = [2, 0], sizes = [1, 128], strides = [1, 1]} : vector<3x128xf32> to vector<1x128xf32>
    %75 = vector.shape_cast %74 : vector<1x128xf32> to vector<1x1x128xf32>
    %76 = vector.broadcast %75 : vector<1x1x128xf32> to vector<1x16x128xf32>
    %77 = arith.mulf %76, %63 : vector<1x16x128xf32>
    %78 = arith.addf %73, %77 : vector<1x16x128xf32>
    %c0_27 = arith.constant 0 : index
    %c0_28 = arith.constant 0 : index
    %79 = vector.load %arg9[%c0_27, %c0_28] : memref<1x128xf32, #tpu.memory_space<vmem>>, vector<1x128xf32>
    %80 = vector.shape_cast %79 : vector<1x128xf32> to vector<1x1x128xf32>
    %81 = vector.broadcast %80 : vector<1x1x128xf32> to vector<1x16x128xf32>
    %82 = arith.addf %78, %81 : vector<1x16x128xf32>
    %c1 = arith.constant 1 : index
    %83 = memref.load %arg3[%c1] : memref<2xf32, #tpu.memory_space<smem>>
    %cst_29 = arith.constant 0.000000e+00 : f32
    %84 = vector.broadcast %cst_29 : f32 to vector<1x16x128xf32>
    %85 = arith.cmpf oge, %82, %84 : vector<1x16x128xf32>
    %86 = vector.broadcast %83 : f32 to vector<1x16x128xf32>
    %87 = arith.mulf %86, %82 : vector<1x16x128xf32>
    %88 = arith.select %85, %82, %87 : vector<1x16x128xi1>, vector<1x16x128xf32>
    %cst_30 = arith.constant dense<0.000000e+00> : vector<1xf32>
    %89 = vector.multi_reduction <add>, %88, %cst_30 [1, 2] : vector<1x16x128xf32> to vector<1xf32>
    %90 = vector.shape_cast %89 : vector<1xf32> to vector<1x1x1xf32>
    %91 = arith.mulf %88, %88 : vector<1x16x128xf32>
    %cst_31 = arith.constant dense<0.000000e+00> : vector<1xf32>
    %92 = vector.multi_reduction <add>, %91, %cst_31 [1, 2] : vector<1x16x128xf32> to vector<1xf32>
    %93 = vector.shape_cast %92 : vector<1xf32> to vector<1x1x1xf32>
    %cst_32 = arith.constant 4.8828125E-4 : f32
    %94 = vector.broadcast %cst_32 : f32 to vector<1x1x1xf32>
    %95 = arith.mulf %90, %94 : vector<1x1x1xf32>
    %cst_33 = arith.constant 4.8828125E-4 : f32
    %96 = vector.broadcast %cst_33 : f32 to vector<1x1x1xf32>
    %97 = arith.mulf %93, %96 : vector<1x1x1xf32>
    %98 = arith.mulf %95, %95 : vector<1x1x1xf32>
    %99 = arith.subf %97, %98 : vector<1x1x1xf32>
    %cst_34 = arith.constant 0.000000e+00 : f32
    %100 = vector.broadcast %cst_34 : f32 to vector<1x1x1xf32>
    %101 = arith.maximumf %99, %100 : vector<1x1x1xf32>
    %c0_35 = arith.constant 0 : index
    %c0_36 = arith.constant 0 : index
    %102 = vector.load %arg10[%c0_35, %c0_36] : memref<1x128xf32, #tpu.memory_space<vmem>>, vector<1x128xf32>
    %cst_37 = arith.constant 9.99999974E-6 : f32
    %103 = vector.broadcast %cst_37 : f32 to vector<1x1x1xf32>
    %104 = arith.addf %101, %103 : vector<1x1x1xf32>
    %105 = math.rsqrt %104 : vector<1x1x1xf32>
    %106 = vector.shape_cast %102 : vector<1x128xf32> to vector<1x1x128xf32>
    %107 = vector.broadcast %105 : vector<1x1x1xf32> to vector<1x1x128xf32>
    %108 = arith.mulf %106, %107 : vector<1x1x128xf32>
    %c0_38 = arith.constant 0 : index
    %c0_39 = arith.constant 0 : index
    %109 = vector.load %arg11[%c0_38, %c0_39] : memref<1x128xf32, #tpu.memory_space<vmem>>, vector<1x128xf32>
    %110 = vector.broadcast %95 : vector<1x1x1xf32> to vector<1x1x128xf32>
    %111 = arith.mulf %110, %108 : vector<1x1x128xf32>
    %112 = vector.shape_cast %109 : vector<1x128xf32> to vector<1x1x128xf32>
    %113 = arith.subf %112, %111 : vector<1x1x128xf32>
    %114 = vector.broadcast %108 : vector<1x1x128xf32> to vector<1x16x128xf32>
    %115 = arith.mulf %88, %114 : vector<1x16x128xf32>
    %116 = vector.broadcast %113 : vector<1x1x128xf32> to vector<1x16x128xf32>
    %117 = arith.addf %115, %116 : vector<1x16x128xf32>
    %118 = vector.shape_cast %117 : vector<1x16x128xf32> to vector<16x128xf32>
    %c0_40 = arith.constant 0 : index
    %c0_41 = arith.constant 0 : index
    %119 = vector.load %arg12[%c0_40, %c0_41] : memref<128x64xf32, #tpu.memory_space<vmem>>, vector<128x64xf32>
    %cst_42 = arith.constant dense<0.000000e+00> : vector<16x64xf32>
    %120 = tpu.matmul %118, %119, %cst_42 {dimension_numbers = #tpu.dot_dimension_numbers<[1], [0], [0], [1], [0, 0, 1, 1], [], []>} : vector<16x128xf32>, vector<128x64xf32>, vector<16x64xf32> -> vector<16x64xf32>
    %c0_43 = arith.constant 0 : index
    %c0_44 = arith.constant 0 : index
    %121 = vector.load %arg13[%c0_43, %c0_44] : memref<1x64xf32, #tpu.memory_space<vmem>>, vector<1x64xf32>
    %122 = vector.broadcast %121 : vector<1x64xf32> to vector<16x64xf32>
    %123 = arith.addf %120, %122 : vector<16x64xf32>
    %124 = vector.shape_cast %123 : vector<16x64xf32> to vector<1x16x64xf32>
    %c0_45 = arith.constant 0 : index
    %c0_46 = arith.constant 0 : index
    %c0_47 = arith.constant 0 : index
    %125 = vector.load %arg1[%c0_45, %c0_46, %c0_47] : memref<1x16x64xf32, #tpu.memory_space<vmem>>, vector<1x16x64xf32>
    %126 = arith.addf %124, %125 : vector<1x16x64xf32>
    %c0_48 = arith.constant 0 : index
    %c0_49 = arith.constant 0 : index
    %c0_50 = arith.constant 0 : index
    %127 = vector.load %arg14[%c0_48, %c0_49, %c0_50] : memref<1x16x64xf32, #tpu.memory_space<vmem>>, vector<1x16x64xf32>
    tpu.vector_store %arg14[%c0_48, %c0_49, %c0_50], %126 {strides = array<i32>} : memref<1x16x64xf32, #tpu.memory_space<vmem>>, vector<1x16x64xf32>,
    return
  }
  func.func @transform_0(%arg0: i32) -> (i32, i32, i32) {
    %c0_i32 = arith.constant 0 : i32
    %c0_i32_0 = arith.constant 0 : i32
    %c0_i32_1 = arith.constant 0 : i32
    return %arg0, %c0_i32, %c0_i32_0 : i32, i32, i32
  }
  func.func @transform_1(%arg0: i32) -> (i32, i32, i32) {
    %c0_i32 = arith.constant 0 : i32
    %c0_i32_0 = arith.constant 0 : i32
    %c0_i32_1 = arith.constant 0 : i32
    return %arg0, %c0_i32, %c0_i32_0 : i32, i32, i32
  }
  func.func @transform_2(%arg0: i32) -> i32 {
    %c0_i32 = arith.constant 0 : i32
    %c0_i32_0 = arith.constant 0 : i32
    return %c0_i32 : i32
  }
  func.func @transform_3(%arg0: i32) -> (i32, i32) {
    %c0_i32 = arith.constant 0 : i32
    %c0_i32_0 = arith.constant 0 : i32
    %c0_i32_1 = arith.constant 0 : i32
    return %c0_i32, %c0_i32_0 : i32, i32
  }
  func.func @transform_4(%arg0: i32) -> (i32, i32) {
    %c0_i32 = arith.constant 0 : i32
    %c0_i32_0 = arith.constant 0 : i32
    %c0_i32_1 = arith.constant 0 : i32
    return %c0_i32, %c0_i32_0 : i32, i32
  }
  func.func @transform_5(%arg0: i32) -> (i32, i32) {
    %c0_i32 = arith.constant 0 : i32
    %c0_i32_0 = arith.constant 0 : i32
    %c0_i32_1 = arith.constant 0 : i32
    return %c0_i32, %c0_i32_0 : i32, i32
  }
  func.func @transform_6(%arg0: i32) -> (i32, i32) {
    %c0_i32 = arith.constant 0 : i32
    %c0_i32_0 = arith.constant 0 : i32
    %c0_i32_1 = arith.constant 0 : i32
    return %c0_i32, %c0_i32_0 : i32, i32
  }
  func.func @transform_7(%arg0: i32) -> (i32, i32) {
    %c0_i32 = arith.constant 0 : i32
    %c0_i32_0 = arith.constant 0 : i32
    %c0_i32_1 = arith.constant 0 : i32
    return %c0_i32, %c0_i32_0 : i32, i32
  }
  func.func @transform_8(%arg0: i32) -> (i32, i32) {
    %c0_i32 = arith.constant 0 : i32
    %c0_i32_0 = arith.constant 0 : i32
    %c0_i32_1 = arith.constant 0 : i32
    return %c0_i32, %c0_i32_0 : i32, i32
  }
  func.func @transform_9(%arg0: i32) -> (i32, i32) {
    %c0_i32 = arith.constant 0 : i32
    %c0_i32_0 = arith.constant 0 : i32
    %c0_i32_1 = arith.constant 0 : i32
    return %c0_i32, %c0_i32_0 : i32, i32
  }
  func.func @transform_10(%arg0: i32) -> (i32, i32) {
    %c0_i32 = arith.constant 0 : i32
    %c0_i32_0 = arith.constant 0 : i32
    %c0_i32_1 = arith.constant 0 : i32
    return %c0_i32, %c0_i32_0 : i32, i32
  }
  func.func @transform_11(%arg0: i32) -> (i32, i32) {
    %c0_i32 = arith.constant 0 : i32
    %c0_i32_0 = arith.constant 0 : i32
    %c0_i32_1 = arith.constant 0 : i32
    return %c0_i32, %c0_i32_0 : i32, i32
  }
  func.func @transform_12(%arg0: i32) -> (i32, i32) {
    %c0_i32 = arith.constant 0 : i32
    %c0_i32_0 = arith.constant 0 : i32
    %c0_i32_1 = arith.constant 0 : i32
    return %c0_i32, %c0_i32_0 : i32, i32
  }
  func.func @transform_13(%arg0: i32) -> (i32, i32, i32) {
    %c0_i32 = arith.constant 0 : i32
    %c0_i32_0 = arith.constant 0 : i32
    %c0_i32_1 = arith.constant 0 : i32
    return %arg0, %c0_i32, %c0_i32_0 : i32, i32, i32
  }
}

</mosaic_0001>

<bundles_post_ra>
// kernel: tpu_custom_call.1
= control target key start
LH: loop header
LB: loop body
LE: loop exit
PB: predicated region body
PF: predicated region fallthrough
CT: control target
= control target key end

     0   :  { %s1513_s0 = inlined_call_operand.vmem [shape: f32[2,16,64], index: 0, kind: input, shape index: {}]   ;;  %s1514_s1 = inlined_call_operand.vmem [shape: f32[2,1,64], index: 1, kind: input, shape index: {}]   ;;  %s1515_s2 = inlined_call_operand.vmem [shape: f32[2], index: 2, kind: input, shape index: {}]   ;;  %s1516_s3 = inlined_call_operand.vmem [shape: f32[64,128], index: 3, kind: input, shape index: {}]   ;;  %s1517_s4 = inlined_call_operand.vmem [shape: f32[1,128], index: 4, kind: input, shape index: {}]   ;;  %s1518_s5 = inlined_call_operand.vmem [shape: f32[1,128], index: 5, kind: input, shape index: {}]   ;;  %s1519_s6 = inlined_call_operand.vmem [shape: f32[1,128], index: 6, kind: input, shape index: {}]   ;;  %s1520_s7 = inlined_call_operand.vmem [shape: f32[3,128], index: 7, kind: input, shape index: {}]   ;;  %s1521_s8 = inlined_call_operand.vmem [shape: f32[1,128], index: 8, kind: input, shape index: {}]   ;;  %s1522_s9 = inlined_call_operand.vmem [shape: f32[1,128], index: 9, kind: input, shape index: {}]   ;;  %s1523_s10 = inlined_call_operand.vmem [shape: f32[1,128], index: 10, kind: input, shape index: {}]   ;;  %s1524_s11 = inlined_call_operand.vmem [shape: f32[128,64], index: 11, kind: input, shape index: {}]   ;;  %s1525_s12 = inlined_call_operand.vmem [shape: f32[1,64], index: 12, kind: input, shape index: {}]   ;;  %s1526_s13 = inlined_call_operand.hbm [shape: f32[2,16,64], index: 13, kind: output, shape index: {}]  }
   0x1   :  { %1530 = sst [smem:[#allocation11_spill]] %s1515_s2 }
   0x2   :  { %18 = vsyncpa [#allocation4], 0 }
   0x3   :  { %19 = vsyncpa [#allocation3], 0 }
   0x4   :  { %21 = vsyncpa [#allocation3 + $0x1], 0  ;;  %s1263_s25 = smov 0   ;;  %s1265_s26 = smov 0  }
   0x5   :  { %s1267_s27 = smov 0   ;;  %s1269_s28 = smov 0  }
   0x6 LB: > { %1531 = sst [smem:[#allocation8_spill]] %s1183_s27  ;;  %s1284_s29 = sadd.s32 4294967295, %s1187_s28   ;;  %s1187_s28 = sphi %s1269_s28, %s1538_s28   ;;  %s1183_s27 = sphi %s1267_s27, %s1540_s27   ;;  %s1179_s26 = sphi %s1265_s26, %s1542_s26   ;;  %s1175_s25 = sphi %s1263_s25, %s1541_s25  }
   0x7   : > { %s947_s30 = sadd.s32 4294967294, %s1187_s28   ;;  %s1288_s14 = sadd.s32 1, %s1187_s28  }
   0x8   : > { %1532 = sst [smem:[#allocation9_spill]] %s1288_s14  ;;  %s317_s15 = sadd.s32 1, %s1183_s27 }
   0x9   : > { %s314_s16 = ssub.s32 %s1187_s28, %s1288_s14  ;;  %p327_p0 = scmp.ne.s32.totalorder %s1183_s27, %s1179_s26 }
   0xa   : > { %p315_p1 = scmp.eq.s32.totalorder %s314_s16, 0  ;;  %p328_p2 = scmp.eq.s32.totalorder %s1284_s29, 1 }
   0xb   : > { %p333_p3 = scmp.ne.s32.totalorder %s1179_s26, %s1175_s25  ;;  %p334_p4 = scmp.eq.s32.totalorder %s947_s30, 1 }
   0xc   : > { %s1299_s17 = scalar_select %p315_p1, %s1183_s27, %s317_s15  }
   0xd   : > { %p1301_p5 = por %p328_p2, %p327_p0  ;;  %p1305_p6 = por %p334_p4, %p333_p3 }
   0xe   : > { %1533 = sst [smem:[#allocation10_spill]] %s1299_s17  ;;  %p948_p7 = scmp.ge.s32.totalorder %s1187_s28, 1 }
   0xf   : > { %p341_p8 = scmp.lt.s32.totalorder %s1187_s28, 3  ;;  %p1066_p9 = scmp.eq.s32.totalorder %s1284_s29, 0 }
  0x10   : > { %s1537_s2 = sld [smem:[#allocation11_spill]] }
  0x11   : > { %p1312_p10 = pnand %p948_p7, %p341_p8 }
  0x13   : > { %p1058_p11 = pneg %p1312_p10 }
  0x15   : > { %p1059_p12 = pnand %p1066_p9, %p1058_p11 }
  0x16   : > { %s354_s23 = sshll.u32 %s1537_s2, 4  ;;  %s355_s23 = int_to_ptr.vmem [resolvable:$true] %s354_s23 }
  0x17   : > { %s1108_s24 = scalar_lea.vmem %s355_s23, 16  ;;  %p1110_p0 = pneg %p1059_p12 }
  0x18   : > { %p1109_p13 = scmp.ne.s32.totalorder %s355_s23, %s1108_s24  ;;  %p1116_p3 = scmp.lt.s32.totalorder %s355_s23, %s355_s23 }
  0x19   : > { %p1117_p4 = scmp.lt.s32.totalorder %s1108_s24, %s1108_s24 }
  0x1a   : > { %p1111_p1 = pnand %p1110_p0, %p1109_p13 }
  0x1b   : > { %p1118_p7 = por %p1117_p4, %p1116_p3 }
  0x1c   : > { %p1112_p2 = pneg %p1111_p1 }
  0x1e   : > { %p1119_p8 = pnand %p1118_p7, %p1112_p2 }
  0x20   : > { %1122 = shalt.err (!%p1119_p8)
}
  0x21   : > { %s1189_s30 = smov [#allocation2]   ;;  %411 = sbr.rel (%p1312_p10) target bundleno = 863 (0x35f), region = 72 }
  0x22   : > { %1061 = dma.vmem_to_smem (!%p1059_p12), %s355_s23, 16, %s1189_s30, [#allocation4]  }
  0x26   : > { %1166 = dma.done.wait (%p1066_p9), [#allocation4], 16  }
  0x27   : > { %1168 = vsyncadd (%p1066_p9), [#allocation4], 4294967280 }
  0x28   : > { %417 = sfence }
  0x29   : > { %v485_v0 = vld [vmem:[%s1516_s3 + $0x38] sm:$0xff]  ;;  %v484_v1 = vld [vmem:[%s1516_s3 + $0x30] sm:$0xff]  ;;  %p459_p11 = scmp.lt.s32.totalorder %s1284_s29, 1  ;;  %v483_v2 = vld [vmem:[%s1516_s3 + $0x28] sm:$0xff]  ;;  %vm493_vm0 = vcmask 523264   ;;  %s575_s16 = sld [smem:[#allocation2]]  ;;  %v616_v47 = vlaneseq }
  0x2a   : > { %998 = vmatprep.subr.mxu0 %v485_v0  ;;  %v482_v3 = vld [vmem:[%s1516_s3 + $0x20] sm:$0xff]  ;;  %v481_v5 = vld [vmem:[%s1516_s3 + $0x18] sm:$0xff]  ;;  %v480_v8 = vld [vmem:[%s1516_s3 + $0x10] sm:$0xff]  ;;  %s969_s2 = sshll.u32 %s1284_s29, 8 }
  0x2b   : > { %999 = vmatpush3.msra.mxu0 %v485_v0  ;;  %s460_s24 = scalar_select %p459_p11, %s1284_s29, 1  ;;  %v479_v9 = vld [vmem:[%s1516_s3 + $0x8] sm:$0xff]  ;;  %v478_v11 = vld [vmem:[%s1516_s3] sm:$0xff]  ;;  %v617_v48 = vshrl.u32 %v616_v47, 7  ;;  %v755_v47 = vld [vmem:[%s1524_s11 + $0x38] sm:$0xff] }
  0x2c   : > { %1000 = vmatprep.subr.mxu0 %v484_v1  ;;  %v957_v13 = vld [vmem:[%s1517_s4] ss:$0 sm:$0xff] }
  0x2d   : > { %1001 = vmatpush3.msra.mxu0 %v484_v1  ;;  %s968_s15 = sshll.u32 %s460_s24, 4  ;;  %s466_s21 = scalar_lea.vmem %s1514_s1, %s460_s24  ;;  %v608_v49 = vld [vmem:[%s1518_s5] sm:$0x1]  ;;  %v1375_v50 = vsub.s32 0, %v617_v48  ;;  %v669_v56 = vsub.s32 1, %v617_v48  ;;  %v643_v59 = vadd.s32 8, %v617_v48 }
  0x2e   : > { %1002 = vmatprep.subr.mxu0 %v483_v2  ;;  %s463_s14 = scalar_lea.vmem %s1513_s0, %s968_s15  ;;  %v956_v4 = vld [vmem:[%s466_s21] ss:$0 sm:$0xff]  ;;  %v677_v60 = vsub.s32 2, %v617_v48  ;;  %vm635_vm3 = vcmp.lt.s32.totalorder %v617_v48, 2  ;;  %vm640_vm4 = vcmp.lt.s32.totalorder %v617_v48, 6  ;;  %vm644_vm5 = vcmp.ge.s32.totalorder %v617_v48, 2 }
  0x2f   : > { %1003 = vmatpush3.msra.mxu0 %v483_v2  ;;  %v1352_v6 = vld [vmem:[%s463_s14] sm:$0xff]  ;;  %v1362_v10 = vld [vmem:[%s463_s14 + $0x8] sm:$0xff]  ;;  %v578_v15 = vstv %s575_s16  ;;  %vm653_vm6 = vcmp.lt.s32.totalorder %v643_v59, 14  ;;  %s961_s24 = sld [smem:[#allocation2 + $0x1]]  ;;  %v754_v48 = vld [vmem:[%s1524_s11 + $0x30] sm:$0xff]  ;;  %s456_s16 = sand.u32 1, %s1179_s26  }
  0x30   : > { %1004 = vmatprep.subr.mxu0 %v482_v3  ;;  %v476_v7 = vadd.f32 %v956_v4, %v1352_v6  ;;  %v477_v12 = vadd.f32 %v956_v4, %v1362_v10  ;;  %v612_v53 = vld [vmem:[%s1519_s6] sm:$0x1]  ;;  %s953_s21 = sshll.u32 %s456_s16, 4  ;;  %s1473_s29 = scalar_lea.sflag [#allocation3], %s456_s16 }
  0x31   : > { %1005 = vmatpush3.msra.mxu0 %v482_v3  ;;  %v660_v58 = vld [vmem:[%s1520_s7] sm:$0x7]  ;;  %s458_s20 = scalar_lea.vmem [#allocation5], %s953_s21  ;;  %s1190_s15 = smov [#allocation5]  }
  0x32   : > { %1006 = vmatprep.subr.mxu0 %v481_v5  ;;  %1014 = vmatprep.mubr.msk.f32.mxu0 %vm493_vm0, %v476_v7  ;;  %v670_v0 = vrot.slane %v660_v58, %v669_v56  ;;  %v664_v3 = vrot.slane %v660_v58, %v1375_v50  ;;  %v678_v4 = vrot.slane %v660_v58, %v677_v60  ;;  %s864_s23 = sshll.u32 %s458_s20, 4  ;;  %s1127_s21 = sshll.u32 %s1190_s15, 4  ;;  %s1468_s23 = int_to_ptr.vmem [resolvable:$true] %s864_s23  ;;  %s1128_s21 = int_to_ptr.vmem [resolvable:$false] %s1127_s21 }
  0x33   : > { %1007 = vmatpush3.msra.mxu0 %v481_v5  ;;  %s1123_s30 = scalar_lea.vmem %s1468_s23, 256  ;;  %s1129_s22 = scalar_lea.vmem %s1128_s21, 512 }
  0x34   : > { %1008 = vmatprep.subr.mxu0 %v480_v8  ;;  %p1124_p9 = scmp.ne.s32.totalorder %s1468_s23, %s1123_s30  ;;  %p1130_p13 = scmp.lt.s32.totalorder %s1468_s23, %s1128_s21 }
  0x35   : > { %1009 = vmatpush3.msra.mxu0 %v480_v8  ;;  %p1131_p0 = scmp.lt.s32.totalorder %s1129_s22, %s1123_s30 }
  0x36   : > { %1010 = vmatprep.subr.mxu0 %v479_v9  ;;  %p1125_p10 = pnand %p1124_p9, %p1301_p5 }
  0x37   : > { %1011 = vmatpush3.msra.mxu0 %v479_v9  ;;  %p1132_p1 = por %p1131_p0, %p1130_p13 }
  0x38   : > { %1012 = vmatprep.subr.mxu0 %v478_v11  ;;  %p1126_p12 = pneg %p1125_p10 }
  0x39   : > { %1013 = vmatpush3.msra.mxu0 %v478_v11 }
  0x3a   : > { %1015 = vmatmul.mubr.msk.f32.vlgmr.msra.gmra.mxu0 %vm493_vm0, %v477_v12  ;;  %p1133_p2 = pnand %p1132_p1, %p1126_p12 }
  0xfa   : > { %v1016_v14 = vpop.f32.mrf.mxu0 }
  0xfb   : > { %v572_v16 = vadd.f32 %v1016_v14, %v957_v13 }
  0xfc   : > { %v566_v17 = vpop.f32.mrf.mxu0 }
  0xfd   : > { %v580_v18 = vmul.f32 %v578_v15, %v572_v16  ;;  %v567_v19 = vadd.f32 %v957_v13, %v566_v17  ;;  %vm577_vm1 = vcmp.ge.f32.partialorder %v572_v16, 0.0 }
  0xff   : > { %v579_v20 = vmul.f32 %v578_v15, %v567_v19  ;;  %vm576_vm2 = vcmp.ge.f32.partialorder %v567_v19, 0.0  ;;  %v582_v22 = vsel %vm577_vm1, %v572_v16, %v580_v18 }
 0x100   : > { %v593_v25 = vmul.f32 %v582_v22, %v582_v22 }
 0x101   : > { %v581_v21 = vsel %vm576_vm2, %v567_v19, %v579_v20 }
 0x102   : > { %v583_v23 = vadd.f32 %v582_v22, %v581_v21  ;;  %v592_v24 = vmul.f32 %v581_v21, %v581_v21 }
 0x104   : > { %584 = vadd.xlane.f32.xlu0 %v583_v23  ;;  %v594_v26 = vadd.f32 %v593_v25, %v592_v24  ;;  %v960_v25 = vld [vmem:[%s1521_s8] ss:$0 sm:$0xff] }
 0x108   : > { %595 = vadd.xlane.f32.xlu0 %v594_v26 }
 0x18d   : > { %v585_v27 = vpop.xlane.xlu0 %584 }
 0x18e   : > { %v586_v28 = vrot.slane %v585_v27, 4 }
 0x190   : > { %v587_v29 = vadd.f32 %v586_v28, %v585_v27  ;;  %v695_v28 = vstv %s961_s24  ;;  %s1466_s24 = scalar_lea.hbm %s1526_s13, %s969_s2 }
 0x191   : > { %v596_v30 = vpop.xlane.xlu0 %595 }
 0x192   : > { %v588_v31 = vrot.slane %v587_v29, 2  ;;  %v597_v32 = vrot.slane %v596_v30, 4 }
 0x194   : > { %v589_v33 = vadd.f32 %v588_v31, %v587_v29  ;;  %v598_v34 = vadd.f32 %v597_v32, %v596_v30 }
 0x196   : > { %v590_v35 = vrot.slane %v589_v33, 1  ;;  %v599_v36 = vrot.slane %v598_v34, 2 }
 0x198   : > { %v591_v37 = vadd.f32 %v590_v35, %v589_v33  ;;  %v600_v38 = vadd.f32 %v599_v36, %v598_v34 }
 0x19a   : > { %v603_v39 = vmul.f32 0.00048828125, %v591_v37  ;;  %v601_v40 = vrot.slane %v600_v38, 1 }
 0x19c   : > { %v602_v41 = vadd.f32 %v601_v40, %v600_v38  ;;  %v605_v42 = vmul.f32 %v603_v39, %v603_v39  ;;  %v762_v40 = vld [vmem:[%s1524_s11 + $0x70] sm:$0xff] }
 0x19e   : > { %v604_v43 = vmul.f32 0.00048828125, %v602_v41  ;;  %v761_v41 = vld [vmem:[%s1524_s11 + $0x68] sm:$0xff] }
 0x1a0   : > { %v606_v44 = vsub.f32 %v604_v43, %v605_v42  ;;  %v760_v42 = vld [vmem:[%s1524_s11 + $0x60] sm:$0xff]  ;;  %v759_v43 = vld [vmem:[%s1524_s11 + $0x58] sm:$0xff] }
 0x1a2   : > { %v607_v45 = vmax.f32 %v606_v44, 0.0  ;;  %v758_v44 = vld [vmem:[%s1524_s11 + $0x50] sm:$0xff] }
 0x1a4   : > { %v609_v46 = vadd.f32 1e-05, %v607_v45  ;;  %v757_v45 = vld [vmem:[%s1524_s11 + $0x48] sm:$0xff] }
 0x1a6   : > { %1104 = vrsqrt.f32 %v609_v46  ;;  %v756_v46 = vld [vmem:[%s1524_s11 + $0x40] sm:$0xff] }
 0x1b3   : > { %v1105_v51 = vpop.eup %1104 }
 0x1b4   : > { %v611_v52 = vmul.f32 %v1105_v51, %v608_v49  ;;  %v753_v49 = vld [vmem:[%s1524_s11 + $0x28] sm:$0xff]  ;;  %v752_v51 = vld [vmem:[%s1524_s11 + $0x20] sm:$0xff] }
 0x1b6   : > { %v613_v54 = vmul.f32 %v611_v52, %v603_v39  ;;  %v619_v55 = vrot.slane %v611_v52, %v1375_v50  ;;  %v763_v39 = vld [vmem:[%s1524_s11 + $0x78] sm:$0xff] }
 0x1b7   : > { %1017 = vmatprep.subr.mxu1 %v763_v39  ;;  %v751_v52 = vld [vmem:[%s1524_s11 + $0x18] sm:$0xff] }
 0x1b8   : > { %v614_v57 = vsub.f32 %v612_v53, %v613_v54  ;;  %v621_v61 = vmul.f32 %v619_v55, %v581_v21  ;;  %v622_v62 = vmul.f32 %v619_v55, %v582_v22  ;;  %1018 = vmatpush3.msra.mxu1 %v763_v39  ;;  %v750_v53 = vld [vmem:[%s1524_s11 + $0x10] sm:$0xff]  ;;  %v749_v54 = vld [vmem:[%s1524_s11 + $0x8] sm:$0xff]  ;;  %v748_v55 = vld [vmem:[%s1524_s11] sm:$0xff] }
 0x1b9   : > { %1019 = vmatprep.subr.mxu1 %v762_v40 }
 0x1ba   : > { %v627_v63 = vrot.slane %v614_v57, %v1375_v50  ;;  %1020 = vmatpush3.msra.mxu1 %v762_v40 }
 0x1bb   : > { %1021 = vmatprep.subr.mxu1 %v761_v41 }
 0x1bc   : > { %v629_v1 = vadd.f32 %v627_v63, %v621_v61  ;;  %v630_v2 = vadd.f32 %v627_v63, %v622_v62  ;;  %1022 = vmatpush3.msra.mxu1 %v761_v41 }
 0x1bd   : > { %1023 = vmatprep.subr.mxu1 %v760_v42 }
 0x1be   : > { %v631_v5 = vrot.slane %v629_v1, 6  ;;  %v632_v7 = vrot.slane %v630_v2, 6  ;;  %v638_v8 = vrot.slane %v629_v1, 2  ;;  %v639_v9 = vrot.slane %v630_v2, 2  ;;  %1024 = vmatpush3.msra.mxu1 %v760_v42 }
 0x1bf   : > { %v672_v14 = vmul.f32 %v670_v0, %v630_v2  ;;  %v671_v20 = vmul.f32 %v670_v0, %v629_v1  ;;  %1025 = vmatprep.subr.mxu1 %v759_v43 }
 0x1c0   : > { %v636_v11 = vsel %vm635_vm3, %v631_v5, %v632_v7  ;;  %v637_v12 = vsel %vm635_vm3, %v632_v7, %v631_v5  ;;  %v642_v13 = vsel %vm640_vm4, %v639_v9, %v638_v8  ;;  %v641_v15 = vsel %vm640_vm4, %v638_v8, %v639_v9  ;;  %1026 = vmatpush3.msra.mxu1 %v759_v43 }
 0x1c1   : > { %v650_v16 = vsel %vm644_vm5, %v637_v12, 0.0  ;;  %v659_v17 = vsel %vm653_vm6, %v642_v13, 0.0  ;;  %v666_v18 = vmul.f32 %v664_v3, %v636_v11  ;;  %v679_v24 = vmul.f32 %v678_v4, %v641_v15  ;;  %1027 = vmatprep.subr.mxu1 %v758_v44 }
 0x1c2   : > { %v665_v19 = vmul.f32 %v664_v3, %v650_v16  ;;  %v680_v21 = vmul.f32 %v678_v4, %v659_v17  ;;  %1028 = vmatpush3.msra.mxu1 %v758_v44  ;;  %v729_v17 = vld [vmem:[%s1523_s10] sm:$0x1] }
 0x1c3   : > { %v674_v22 = vadd.f32 %v672_v14, %v666_v18  ;;  %1029 = vmatprep.subr.mxu1 %v757_v45  ;;  %v725_v14 = vld [vmem:[%s1522_s9] sm:$0x1] }
 0x1c4   : > { %v673_v23 = vadd.f32 %v671_v20, %v665_v19  ;;  %1030 = vmatpush3.msra.mxu1 %v757_v45 }
 0x1c5   : > { %v682_v26 = vadd.f32 %v680_v21, %v674_v22  ;;  %1031 = vmatprep.subr.mxu1 %v756_v46 }
 0x1c6   : > { %v681_v27 = vadd.f32 %v679_v24, %v673_v23  ;;  %1032 = vmatpush3.msra.mxu1 %v756_v46 }
 0x1c7   : > { %v691_v29 = vadd.f32 %v960_v25, %v682_v26  ;;  %1033 = vmatprep.subr.mxu1 %v755_v47  ;;  %v962_v26 = vld [vmem:[%s1525_s12] ss:$0 sm:$0xff] }
 0x1c8   : > { %v690_v30 = vadd.f32 %v960_v25, %v681_v27  ;;  %1034 = vmatpush3.msra.mxu1 %v755_v47 }
 0x1c9   : > { %vm694_vm7 = vcmp.ge.f32.partialorder %v691_v29, 0.0  ;;  %v697_v31 = vmul.f32 %v695_v28, %v691_v29  ;;  %1035 = vmatprep.subr.mxu1 %v754_v48 }
 0x1ca   : > { %vm693_vm8 = vcmp.ge.f32.partialorder %v690_v30, 0.0  ;;  %v696_v32 = vmul.f32 %v695_v28, %v690_v30  ;;  %1036 = vmatpush3.msra.mxu1 %v754_v48 }
 0x1cb   : > { %v1389_v33 = vsel %vm694_vm7, %v691_v29, %v697_v31  ;;  %1037 = vmatprep.subr.mxu1 %v753_v49 }
 0x1cc   : > { %v1391_v34 = vsel %vm693_vm8, %v690_v30, %v696_v32  ;;  %v710_v37 = vmul.f32 %v1389_v33, %v1389_v33  ;;  %1038 = vmatpush3.msra.mxu1 %v753_v49 }
 0x1cd   : > { %v700_v35 = vadd.f32 %v1389_v33, %v1391_v34  ;;  %v709_v36 = vmul.f32 %v1391_v34, %v1391_v34  ;;  %1039 = vmatprep.subr.mxu1 %v752_v51 }
 0x1ce   : > { %1040 = vmatpush3.msra.mxu1 %v752_v51 }
 0x1cf   : > { %701 = vadd.xlane.f32.xlu1 %v700_v35  ;;  %v711_v38 = vadd.f32 %v710_v37, %v709_v36  ;;  %1041 = vmatprep.subr.mxu1 %v751_v52 }
 0x1d0   : > { %1042 = vmatpush3.msra.mxu1 %v751_v52 }
 0x1d1   : > { %1043 = vmatprep.subr.mxu1 %v750_v53 }
 0x1d2   : > { %1044 = vmatpush3.msra.mxu1 %v750_v53 }
 0x1d3   : > { %712 = vadd.xlane.f32.xlu1 %v711_v38  ;;  %1045 = vmatprep.subr.mxu1 %v749_v54 }
 0x1d4   : > { %1046 = vmatpush3.msra.mxu1 %v749_v54 }
 0x1d5   : > { %1047 = vmatprep.subr.mxu1 %v748_v55 }
 0x1d6   : > { %1048 = vmatpush3.msra.mxu1 %v748_v55 }
 0x258   : > { %v702_v56 = vpop.xlane.xlu1 %701 }
 0x259   : > { %v703_v57 = vrot.slane %v702_v56, 4 }
 0x25b   : > { %v704_v58 = vadd.f32 %v703_v57, %v702_v56 }
 0x25c   : > { %v713_v59 = vpop.xlane.xlu1 %712 }
 0x25d   : > { %v705_v60 = vrot.slane %v704_v58, 2  ;;  %v714_v61 = vrot.slane %v713_v59, 4 }
 0x25f   : > { %v706_v62 = vadd.f32 %v705_v60, %v704_v58  ;;  %v715_v63 = vadd.f32 %v714_v61, %v713_v59 }
 0x261   : > { %v707_v0 = vrot.slane %v706_v62, 1  ;;  %v716_v1 = vrot.slane %v715_v63, 2 }
 0x263   : > { %v708_v2 = vadd.f32 %v707_v0, %v706_v62  ;;  %v717_v3 = vadd.f32 %v716_v1, %v715_v63 }
 0x265   : > { %v720_v4 = vmul.f32 0.00048828125, %v708_v2  ;;  %v718_v5 = vrot.slane %v717_v3, 1 }
 0x267   : > { %v719_v7 = vadd.f32 %v718_v5, %v717_v3  ;;  %v722_v8 = vmul.f32 %v720_v4, %v720_v4 }
 0x269   : > { %v721_v9 = vmul.f32 0.00048828125, %v719_v7 }
 0x26b   : > { %v723_v11 = vsub.f32 %v721_v9, %v722_v8 }
 0x26d   : > { %v724_v12 = vmax.f32 %v723_v11, 0.0 }
 0x26f   : > { %v726_v13 = vadd.f32 1e-05, %v724_v12 }
 0x271   : > { %1106 = vrsqrt.f32 %v726_v13 }
 0x27e   : > { %v1107_v15 = vpop.eup %1106 }
 0x27f   : > { %v728_v16 = vmul.f32 %v1107_v15, %v725_v14 }
 0x281   : > { %v730_v18 = vmul.f32 %v728_v16, %v720_v4  ;;  %v736_v19 = vrot.slane %v728_v16, %v1375_v50 }
 0x283   : > { %v731_v20 = vsub.f32 %v729_v17, %v730_v18  ;;  %v738_v21 = vmul.f32 %v736_v19, %v1391_v34  ;;  %v739_v23 = vmul.f32 %v736_v19, %v1389_v33 }
 0x285   : > { %v744_v22 = vrot.slane %v731_v20, %v1375_v50 }
 0x287   : > { %v746_v24 = vadd.f32 %v744_v22, %v738_v21  ;;  %v747_v25 = vadd.f32 %v744_v22, %v739_v23 }
 0x289   : > { %1049 = vmatprep.mubr.f32.mxu1 %v746_v24 }
 0x28a   : > { %1050 = vmatmul.mubr.f32.vlgmr.msra.gmra.mxu1 %v747_v25 }
 0x34a   : > { %v1051_v27 = vpop.f32.mrf.mxu1 }
 0x34b   : > { %v843_v28 = vadd.f32 %v1051_v27, %v962_v26 }
 0x34c   : > { %v837_v29 = vpop.f32.mrf.mxu1 }
 0x34d   : > { %v847_v50 = vadd.f32 %v843_v28, %v1362_v10  ;;  %v838_v30 = vadd.f32 %v962_v26, %v837_v29 }
 0x34f   : > { %849 = vst.msk [vmem:[%s458_s20 + $0x8] sm:$0xff] %vm493_vm0, %v847_v50  ;;  %v846_v31 = vadd.f32 %v838_v30, %v1352_v6 }
 0x351   : > { %848 = vst.msk [vmem:[%s458_s20] sm:$0xff] %vm493_vm0, %v846_v31 }
 0x352   : > { %1136 = shalt.err (!%p1133_p2)
}
 0x353   : > { %s1137_s16 = scalar_lea.hbm %s1466_s24, 256  ;;  %s1141_s2 = scalar_lea.hbm %s1526_s13, 512 }
 0x354   : > { %p1138_p3 = scmp.ne.s32.totalorder %s1466_s24, %s1137_s16  ;;  %p1142_p8 = scmp.lt.s32.totalorder %s1466_s24, %s1526_s13 }
 0x355   : > { %p1143_p11 = scmp.lt.s32.totalorder %s1141_s2, %s1137_s16 }
 0x356   : > { %p1139_p4 = pnand %p1138_p3, %p1301_p5 }
 0x357   : > { %p1144_p9 = por %p1143_p11, %p1142_p8 }
 0x358   : > { %p1140_p7 = pneg %p1139_p4 }
 0x35a   : > { %p1145_p10 = pnand %p1144_p9, %p1140_p7 }
 0x35c   : > { %1148 = shalt.err (!%p1145_p10)
}
 0x35d   : > { %s1191_s30 = smov 128   ;;  %s1192_s15 = smov 8  }
 0x35e   : > { %1056 = dma.vmem_to_hbm [thread:$0]  (%p1301_p5), %s1468_s23, 256, %s1466_s24, %s1473_s29, %s1191_s30, %s1191_s30, %s1192_s15  }
 0x35f PF: > { %p1068_p12 = scmp.ge.s32.totalorder %s1187_s28, 2  ;;  %s879_s21 = sand.u32 1, %s1175_s25  }
 0x360   : > { %s880_s22 = scalar_lea.sflag [#allocation3], %s879_s21 }
 0x361   : > { %p1063_p13 = pnand %p1068_p12, %p1305_p6 }
 0x363   : > { %p1064_p0 = pneg %p1063_p13 }
 0x365   : > { %1170 = dma.done.wait (%p1064_p0), %s880_s22, 256  }
 0x366   : > { %1172 = vsyncadd (%p1064_p0), %s880_s22, 4294967040  ;;  %s1538_s28 = sld [smem:[#allocation9_spill]]  ;;  %s1541_s25 = smov %s1179_s26 }
 0x367   : > { %s1539_s16 = sld [smem:[#allocation8_spill]] }
 0x368   : > { %s1540_s27 = sld [smem:[#allocation10_spill]] }
 0x36c   : > { %p24_p1 = scmp.ge.s32.totalorder %s1538_s28, 4  }
 0x36d   : > { %s1542_s26 = smov %s1539_s16 }
 0x36e   :  { %26 = sbr.rel (!%p24_p1) target bundleno = 6 (0x6), region = 115 }
 0x373   :  { %885 = vsyncpa [#allocation3], 1 }
 0x374   :  { %887 = vsyncpa [#allocation3 + $0x1], 1 }
 0x375   :  { %888 = vsyncpa [#allocation4], 1 }
 0x376   :  { %890 = vsyncpa [#allocation4 + $0x1], 1 }

// kernel: tpu_custom_call.1
= control target key start
LH: loop header
LB: loop body
LE: loop exit
PB: predicated region body
PF: predicated region fallthrough
CT: control target
= control target key end

     0   :  { %s1513_s0 = inlined_call_operand.vmem [shape: f32[2,16,64], index: 0, kind: input, shape index: {}]   ;;  %s1514_s1 = inlined_call_operand.vmem [shape: f32[2,1,64], index: 1, kind: input, shape index: {}]   ;;  %s1515_s2 = inlined_call_operand.vmem [shape: f32[2], index: 2, kind: input, shape index: {}]   ;;  %s1516_s3 = inlined_call_operand.vmem [shape: f32[64,128], index: 3, kind: input, shape index: {}]   ;;  %s1517_s4 = inlined_call_operand.vmem [shape: f32[1,128], index: 4, kind: input, shape index: {}]   ;;  %s1518_s5 = inlined_call_operand.vmem [shape: f32[1,128], index: 5, kind: input, shape index: {}]   ;;  %s1519_s6 = inlined_call_operand.vmem [shape: f32[1,128], index: 6, kind: input, shape index: {}]   ;;  %s1520_s7 = inlined_call_operand.vmem [shape: f32[3,128], index: 7, kind: input, shape index: {}]   ;;  %s1521_s8 = inlined_call_operand.vmem [shape: f32[1,128], index: 8, kind: input, shape index: {}]   ;;  %s1522_s9 = inlined_call_operand.vmem [shape: f32[1,128], index: 9, kind: input, shape index: {}]   ;;  %s1523_s10 = inlined_call_operand.vmem [shape: f32[1,128], index: 10, kind: input, shape index: {}]   ;;  %s1524_s11 = inlined_call_operand.vmem [shape: f32[128,64], index: 11, kind: input, shape index: {}]   ;;  %s1525_s12 = inlined_call_operand.vmem [shape: f32[1,64], index: 12, kind: input, shape index: {}]   ;;  %s1526_s13 = inlined_call_operand.hbm [shape: f32[2,16,64], index: 13, kind: output, shape index: {}]  }
   0x1   :  { %1530 = sst [smem:[#allocation11_spill]] %s1515_s2 }
   0x2   :  { %18 = vsyncpa [#allocation4], 0 }
   0x3   :  { %19 = vsyncpa [#allocation3], 0 }
   0x4   :  { %21 = vsyncpa [#allocation3 + $0x1], 0  ;;  %s1263_s25 = smov 0   ;;  %s1265_s26 = smov 0  }
   0x5   :  { %s1267_s27 = smov 0   ;;  %s1269_s28 = smov 0  }
   0x6 LB: > { %1531 = sst [smem:[#allocation8_spill]] %s1183_s27  ;;  %s1284_s29 = sadd.s32 4294967295, %s1187_s28   ;;  %s1187_s28 = sphi %s1269_s28, %s1538_s28   ;;  %s1183_s27 = sphi %s1267_s27, %s1540_s27   ;;  %s1179_s26 = sphi %s1265_s26, %s1542_s26   ;;  %s1175_s25 = sphi %s1263_s25, %s1541_s25  }
   0x7   : > { %s947_s30 = sadd.s32 4294967294, %s1187_s28   ;;  %s1288_s14 = sadd.s32 1, %s1187_s28  }
   0x8   : > { %1532 = sst [smem:[#allocation9_spill]] %s1288_s14  ;;  %s317_s15 = sadd.s32 1, %s1183_s27 }
   0x9   : > { %s314_s16 = ssub.s32 %s1187_s28, %s1288_s14  ;;  %p327_p0 = scmp.ne.s32.totalorder %s1183_s27, %s1179_s26 }
   0xa   : > { %p315_p1 = scmp.eq.s32.totalorder %s314_s16, 0  ;;  %p328_p2 = scmp.eq.s32.totalorder %s1284_s29, 1 }
   0xb   : > { %p333_p3 = scmp.ne.s32.totalorder %s1179_s26, %s1175_s25  ;;  %p334_p4 = scmp.eq.s32.totalorder %s947_s30, 1 }
   0xc   : > { %s1299_s17 = scalar_select %p315_p1, %s1183_s27, %s317_s15  }
   0xd   : > { %p1301_p5 = por %p328_p2, %p327_p0  ;;  %p1305_p6 = por %p334_p4, %p333_p3 }
   0xe   : > { %1533 = sst [smem:[#allocation10_spill]] %s1299_s17  ;;  %p948_p7 = scmp.ge.s32.totalorder %s1187_s28, 1 }
   0xf   : > { %p341_p8 = scmp.lt.s32.totalorder %s1187_s28, 3  ;;  %p1066_p9 = scmp.eq.s32.totalorder %s1284_s29, 0 }
  0x10   : > { %s1537_s2 = sld [smem:[#allocation11_spill]] }
  0x11   : > { %p1312_p10 = pnand %p948_p7, %p341_p8 }
  0x13   : > { %p1058_p11 = pneg %p1312_p10 }
  0x15   : > { %p1059_p12 = pnand %p1066_p9, %p1058_p11 }
  0x16   : > { %s354_s23 = sshll.u32 %s1537_s2, 4  ;;  %s355_s23 = int_to_ptr.vmem [resolvable:$true] %s354_s23 }
  0x17   : > { %s1108_s24 = scalar_lea.vmem %s355_s23, 16  ;;  %p1110_p0 = pneg %p1059_p12 }
  0x18   : > { %p1109_p13 = scmp.ne.s32.totalorder %s355_s23, %s1108_s24  ;;  %p1116_p3 = scmp.lt.s32.totalorder %s355_s23, %s355_s23 }
  0x19   : > { %p1117_p4 = scmp.lt.s32.totalorder %s1108_s24, %s1108_s24 }
  0x1a   : > { %p1111_p1 = pnand %p1110_p0, %p1109_p13 }
  0x1b   : > { %p1118_p7 = por %p1117_p4, %p1116_p3 }
  0x1c   : > { %p1112_p2 = pneg %p1111_p1 }
  0x1e   : > { %p1119_p8 = pnand %p1118_p7, %p1112_p2 }
  0x20   : > { %1122 = shalt.err (!%p1119_p8)
}
  0x21   : > { %s1189_s30 = smov [#allocation2]   ;;  %411 = sbr.rel (%p1312_p10) target bundleno = 863 (0x35f), region = 72 }
  0x22   : > { %1061 = dma.vmem_to_smem (!%p1059_p12), %s355_s23, 16, %s1189_s30, [#allocation4]  }
  0x26   : > { %1166 = dma.done.wait (%p1066_p9), [#allocation4], 16  }
  0x27   : > { %1168 = vsyncadd (%p1066_p9), [#allocation4], 4294967280 }
  0x28   : > { %417 = sfence }
  0x29   : > { %v485_v0 = vld [vmem:[%s1516_s3 + $0x38] sm:$0xff]  ;;  %v484_v1 = vld [vmem:[%s1516_s3 + $0x30] sm:$0xff]  ;;  %p459_p11 = scmp.lt.s32.totalorder %s1284_s29, 1  ;;  %v483_v2 = vld [vmem:[%s1516_s3 + $0x28] sm:$0xff]  ;;  %vm493_vm0 = vcmask 523264   ;;  %s575_s16 = sld [smem:[#allocation2]]  ;;  %v616_v47 = vlaneseq }
  0x2a   : > { %998 = vmatprep.subr.mxu0 %v485_v0  ;;  %v482_v3 = vld [vmem:[%s1516_s3 + $0x20] sm:$0xff]  ;;  %v481_v5 = vld [vmem:[%s1516_s3 + $0x18] sm:$0xff]  ;;  %v480_v8 = vld [vmem:[%s1516_s3 + $0x10] sm:$0xff]  ;;  %s969_s2 = sshll.u32 %s1284_s29, 8 }
  0x2b   : > { %999 = vmatpush3.msra.mxu0 %v485_v0  ;;  %s460_s24 = scalar_select %p459_p11, %s1284_s29, 1  ;;  %v479_v9 = vld [vmem:[%s1516_s3 + $0x8] sm:$0xff]  ;;  %v478_v11 = vld [vmem:[%s1516_s3] sm:$0xff]  ;;  %v617_v48 = vshrl.u32 %v616_v47, 7  ;;  %v755_v47 = vld [vmem:[%s1524_s11 + $0x38] sm:$0xff] }
  0x2c   : > { %1000 = vmatprep.subr.mxu0 %v484_v1  ;;  %v957_v13 = vld [vmem:[%s1517_s4] ss:$0 sm:$0xff] }
  0x2d   : > { %1001 = vmatpush3.msra.mxu0 %v484_v1  ;;  %s968_s15 = sshll.u32 %s460_s24, 4  ;;  %s466_s21 = scalar_lea.vmem %s1514_s1, %s460_s24  ;;  %v608_v49 = vld [vmem:[%s1518_s5] sm:$0x1]  ;;  %v1375_v50 = vsub.s32 0, %v617_v48  ;;  %v669_v56 = vsub.s32 1, %v617_v48  ;;  %v643_v59 = vadd.s32 8, %v617_v48 }
  0x2e   : > { %1002 = vmatprep.subr.mxu0 %v483_v2  ;;  %s463_s14 = scalar_lea.vmem %s1513_s0, %s968_s15  ;;  %v956_v4 = vld [vmem:[%s466_s21] ss:$0 sm:$0xff]  ;;  %v677_v60 = vsub.s32 2, %v617_v48  ;;  %vm635_vm3 = vcmp.lt.s32.totalorder %v617_v48, 2  ;;  %vm640_vm4 = vcmp.lt.s32.totalorder %v617_v48, 6  ;;  %vm644_vm5 = vcmp.ge.s32.totalorder %v617_v48, 2 }
  0x2f   : > { %1003 = vmatpush3.msra.mxu0 %v483_v2  ;;  %v1352_v6 = vld [vmem:[%s463_s14] sm:$0xff]  ;;  %v1362_v10 = vld [vmem:[%s463_s14 + $0x8] sm:$0xff]  ;;  %v578_v15 = vstv %s575_s16  ;;  %vm653_vm6 = vcmp.lt.s32.totalorder %v643_v59, 14  ;;  %s961_s24 = sld [smem:[#allocation2 + $0x1]]  ;;  %v754_v48 = vld [vmem:[%s1524_s11 + $0x30] sm:$0xff]  ;;  %s456_s16 = sand.u32 1, %s1179_s26  }
  0x30   : > { %1004 = vmatprep.subr.mxu0 %v482_v3  ;;  %v476_v7 = vadd.f32 %v956_v4, %v1352_v6  ;;  %v477_v12 = vadd.f32 %v956_v4, %v1362_v10  ;;  %v612_v53 = vld [vmem:[%s1519_s6] sm:$0x1]  ;;  %s953_s21 = sshll.u32 %s456_s16, 4  ;;  %s1473_s29 = scalar_lea.sflag [#allocation3], %s456_s16 }
  0x31   : > { %1005 = vmatpush3.msra.mxu0 %v482_v3  ;;  %v660_v58 = vld [vmem:[%s1520_s7] sm:$0x7]  ;;  %s458_s20 = scalar_lea.vmem [#allocation5], %s953_s21  ;;  %s1190_s15 = smov [#allocation5]  }
  0x32   : > { %1006 = vmatprep.subr.mxu0 %v481_v5  ;;  %1014 = vmatprep.mubr.msk.f32.mxu0 %vm493_vm0, %v476_v7  ;;  %v670_v0 = vrot.slane %v660_v58, %v669_v56  ;;  %v664_v3 = vrot.slane %v660_v58, %v1375_v50  ;;  %v678_v4 = vrot.slane %v660_v58, %v677_v60  ;;  %s864_s23 = sshll.u32 %s458_s20, 4  ;;  %s1127_s21 = sshll.u32 %s1190_s15, 4  ;;  %s1468_s23 = int_to_ptr.vmem [resolvable:$true] %s864_s23  ;;  %s1128_s21 = int_to_ptr.vmem [resolvable:$false] %s1127_s21 }
  0x33   : > { %1007 = vmatpush3.msra.mxu0 %v481_v5  ;;  %s1123_s30 = scalar_lea.vmem %s1468_s23, 256  ;;  %s1129_s22 = scalar_lea.vmem %s1128_s21, 512 }
  0x34   : > { %1008 = vmatprep.subr.mxu0 %v480_v8  ;;  %p1124_p9 = scmp.ne.s32.totalorder %s1468_s23, %s1123_s30  ;;  %p1130_p13 = scmp.lt.s32.totalorder %s1468_s23, %s1128_s21 }
  0x35   : > { %1009 = vmatpush3.msra.mxu0 %v480_v8  ;;  %p1131_p0 = scmp.lt.s32.totalorder %s1129_s22, %s1123_s30 }
  0x36   : > { %1010 = vmatprep.subr.mxu0 %v479_v9  ;;  %p1125_p10 = pnand %p1124_p9, %p1301_p5 }
  0x37   : > { %1011 = vmatpush3.msra.mxu0 %v479_v9  ;;  %p1132_p1 = por %p1131_p0, %p1130_p13 }
  0x38   : > { %1012 = vmatprep.subr.mxu0 %v478_v11  ;;  %p1126_p12 = pneg %p1125_p10 }
  0x39   : > { %1013 = vmatpush3.msra.mxu0 %v478_v11 }
  0x3a   : > { %1015 = vmatmul.mubr.msk.f32.vlgmr.msra.gmra.mxu0 %vm493_vm0, %v477_v12  ;;  %p1133_p2 = pnand %p1132_p1, %p1126_p12 }
  0xfa   : > { %v1016_v14 = vpop.f32.mrf.mxu0 }
  0xfb   : > { %v572_v16 = vadd.f32 %v1016_v14, %v957_v13 }
  0xfc   : > { %v566_v17 = vpop.f32.mrf.mxu0 }
  0xfd   : > { %v580_v18 = vmul.f32 %v578_v15, %v572_v16  ;;  %v567_v19 = vadd.f32 %v957_v13, %v566_v17  ;;  %vm577_vm1 = vcmp.ge.f32.partialorder %v572_v16, 0.0 }
  0xff   : > { %v579_v20 = vmul.f32 %v578_v15, %v567_v19  ;;  %vm576_vm2 = vcmp.ge.f32.partialorder %v567_v19, 0.0  ;;  %v582_v22 = vsel %vm577_vm1, %v572_v16, %v580_v18 }
 0x100   : > { %v593_v25 = vmul.f32 %v582_v22, %v582_v22 }
 0x101   : > { %v581_v21 = vsel %vm576_vm2, %v567_v19, %v579_v20 }
 0x102   : > { %v583_v23 = vadd.f32 %v582_v22, %v581_v21  ;;  %v592_v24 = vmul.f32 %v581_v21, %v581_v21 }
 0x104   : > { %584 = vadd.xlane.f32.xlu0 %v583_v23  ;;  %v594_v26 = vadd.f32 %v593_v25, %v592_v24  ;;  %v960_v25 = vld [vmem:[%s1521_s8] ss:$0 sm:$0xff] }
 0x108   : > { %595 = vadd.xlane.f32.xlu0 %v594_v26 }
 0x18d   : > { %v585_v27 = vpop.xlane.xlu0 %584 }
 0x18e   : > { %v586_v28 = vrot.slane %v585_v27, 4 }
 0x190   : > { %v587_v29 = vadd.f32 %v586_v28, %v585_v27  ;;  %v695_v28 = vstv %s961_s24  ;;  %s1466_s24 = scalar_lea.hbm %s1526_s13, %s969_s2 }
 0x191   : > { %v596_v30 = vpop.xlane.xlu0 %595 }
 0x192   : > { %v588_v31 = vrot.slane %v587_v29, 2  ;;  %v597_v32 = vrot.slane %v596_v30, 4 }
 0x194   : > { %v589_v33 = vadd.f32 %v588_v31, %v587_v29  ;;  %v598_v34 = vadd.f32 %v597_v32, %v596_v30 }
 0x196   : > { %v590_v35 = vrot.slane %v589_v33, 1  ;;  %v599_v36 = vrot.slane %v598_v34, 2 }
 0x198   : > { %v591_v37 = vadd.f32 %v590_v35, %v589_v33  ;;  %v600_v38 = vadd.f32 %v599_v36, %v598_v34 }
 0x19a   : > { %v603_v39 = vmul.f32 0.00048828125, %v591_v37  ;;  %v601_v40 = vrot.slane %v600_v38, 1 }
 0x19c   : > { %v602_v41 = vadd.f32 %v601_v40, %v600_v38  ;;  %v605_v42 = vmul.f32 %v603_v39, %v603_v39  ;;  %v762_v40 = vld [vmem:[%s1524_s11 + $0x70] sm:$0xff] }
 0x19e   : > { %v604_v43 = vmul.f32 0.00048828125, %v602_v41  ;;  %v761_v41 = vld [vmem:[%s1524_s11 + $0x68] sm:$0xff] }
 0x1a0   : > { %v606_v44 = vsub.f32 %v604_v43, %v605_v42  ;;  %v760_v42 = vld [vmem:[%s1524_s11 + $0x60] sm:$0xff]  ;;  %v759_v43 = vld [vmem:[%s1524_s11 + $0x58] sm:$0xff] }
 0x1a2   : > { %v607_v45 = vmax.f32 %v606_v44, 0.0  ;;  %v758_v44 = vld [vmem:[%s1524_s11 + $0x50] sm:$0xff] }
 0x1a4   : > { %v609_v46 = vadd.f32 1e-05, %v607_v45  ;;  %v757_v45 = vld [vmem:[%s1524_s11 + $0x48] sm:$0xff] }
 0x1a6   : > { %1104 = vrsqrt.f32 %v609_v46  ;;  %v756_v46 = vld [vmem:[%s1524_s11 + $0x40] sm:$0xff] }
 0x1b3   : > { %v1105_v51 = vpop.eup %1104 }
 0x1b4   : > { %v611_v52 = vmul.f32 %v1105_v51, %v608_v49  ;;  %v753_v49 = vld [vmem:[%s1524_s11 + $0x28] sm:$0xff]  ;;  %v752_v51 = vld [vmem:[%s1524_s11 + $0x20] sm:$0xff] }
 0x1b6   : > { %v613_v54 = vmul.f32 %v611_v52, %v603_v39  ;;  %v619_v55 = vrot.slane %v611_v52, %v1375_v50  ;;  %v763_v39 = vld [vmem:[%s1524_s11 + $0x78] sm:$0xff] }
 0x1b7   : > { %1017 = vmatprep.subr.mxu1 %v763_v39  ;;  %v751_v52 = vld [vmem:[%s1524_s11 + $0x18] sm:$0xff] }
 0x1b8   : > { %v614_v57 = vsub.f32 %v612_v53, %v613_v54  ;;  %v621_v61 = vmul.f32 %v619_v55, %v581_v21  ;;  %v622_v62 = vmul.f32 %v619_v55, %v582_v22  ;;  %1018 = vmatpush3.msra.mxu1 %v763_v39  ;;  %v750_v53 = vld [vmem:[%s1524_s11 + $0x10] sm:$0xff]  ;;  %v749_v54 = vld [vmem:[%s1524_s11 + $0x8] sm:$0xff]  ;;  %v748_v55 = vld [vmem:[%s1524_s11] sm:$0xff] }
 0x1b9   : > { %1019 = vmatprep.subr.mxu1 %v762_v40 }
 0x1ba   : > { %v627_v63 = vrot.slane %v614_v57, %v1375_v50  ;;  %1020 = vmatpush3.msra.mxu1 %v762_v40 }
 0x1bb   : > { %1021 = vmatprep.subr.mxu1 %v761_v41 }
 0x1bc   : > { %v629_v1 = vadd.f32 %v627_v63, %v621_v61  ;;  %v630_v2 = vadd.f32 %v627_v63, %v622_v62  ;;  %1022 = vmatpush3.msra.mxu1 %v761_v41 }
 0x1bd   : > { %1023 = vmatprep.subr.mxu1 %v760_v42 }
 0x1be   : > { %v631_v5 = vrot.slane %v629_v1, 6  ;;  %v632_v7 = vrot.slane %v630_v2, 6  ;;  %v638_v8 = vrot.slane %v629_v1, 2  ;;  %v639_v9 = vrot.slane %v630_v2, 2  ;;  %1024 = vmatpush3.msra.mxu1 %v760_v42 }
 0x1bf   : > { %v672_v14 = vmul.f32 %v670_v0, %v630_v2  ;;  %v671_v20 = vmul.f32 %v670_v0, %v629_v1  ;;  %1025 = vmatprep.subr.mxu1 %v759_v43 }
 0x1c0   : > { %v636_v11 = vsel %vm635_vm3, %v631_v5, %v632_v7  ;;  %v637_v12 = vsel %vm635_vm3, %v632_v7, %v631_v5  ;;  %v642_v13 = vsel %vm640_vm4, %v639_v9, %v638_v8  ;;  %v641_v15 = vsel %vm640_vm4, %v638_v8, %v639_v9  ;;  %1026 = vmatpush3.msra.mxu1 %v759_v43 }
 0x1c1   : > { %v650_v16 = vsel %vm644_vm5, %v637_v12, 0.0  ;;  %v659_v17 = vsel %vm653_vm6, %v642_v13, 0.0  ;;  %v666_v18 = vmul.f32 %v664_v3, %v636_v11  ;;  %v679_v24 = vmul.f32 %v678_v4, %v641_v15  ;;  %1027 = vmatprep.subr.mxu1 %v758_v44 }
 0x1c2   : > { %v665_v19 = vmul.f32 %v664_v3, %v650_v16  ;;  %v680_v21 = vmul.f32 %v678_v4, %v659_v17  ;;  %1028 = vmatpush3.msra.mxu1 %v758_v44  ;;  %v729_v17 = vld [vmem:[%s1523_s10] sm:$0x1] }
 0x1c3   : > { %v674_v22 = vadd.f32 %v672_v14, %v666_v18  ;;  %1029 = vmatprep.subr.mxu1 %v757_v45  ;;  %v725_v14 = vld [vmem:[%s1522_s9] sm:$0x1] }
 0x1c4   : > { %v673_v23 = vadd.f32 %v671_v20, %v665_v19  ;;  %1030 = vmatpush3.msra.mxu1 %v757_v45 }
 0x1c5   : > { %v682_v26 = vadd.f32 %v680_v21, %v674_v22  ;;  %1031 = vmatprep.subr.mxu1 %v756_v46 }
 0x1c6   : > { %v681_v27 = vadd.f32 %v679_v24, %v673_v23  ;;  %1032 = vmatpush3.msra.mxu1 %v756_v46 }
 0x1c7   : > { %v691_v29 = vadd.f32 %v960_v25, %v682_v26  ;;  %1033 = vmatprep.subr.mxu1 %v755_v47  ;;  %v962_v26 = vld [vmem:[%s1525_s12] ss:$0 sm:$0xff] }
 0x1c8   : > { %v690_v30 = vadd.f32 %v960_v25, %v681_v27  ;;  %1034 = vmatpush3.msra.mxu1 %v755_v47 }
 0x1c9   : > { %vm694_vm7 = vcmp.ge.f32.partialorder %v691_v29, 0.0  ;;  %v697_v31 = vmul.f32 %v695_v28, %v691_v29  ;;  %1035 = vmatprep.subr.mxu1 %v754_v48 }
 0x1ca   : > { %vm693_vm8 = vcmp.ge.f32.partialorder %v690_v30, 0.0  ;;  %v696_v32 = vmul.f32 %v695_v28, %v690_v30  ;;  %1036 = vmatpush3.msra.mxu1 %v754_v48 }
 0x1cb   : > { %v1389_v33 = vsel %vm694_vm7, %v691_v29, %v697_v31  ;;  %1037 = vmatprep.subr.mxu1 %v753_v49 }
 0x1cc   : > { %v1391_v34 = vsel %vm693_vm8, %v690_v30, %v696_v32  ;;  %v710_v37 = vmul.f32 %v1389_v33, %v1389_v33  ;;  %1038 = vmatpush3.msra.mxu1 %v753_v49 }
 0x1cd   : > { %v700_v35 = vadd.f32 %v1389_v33, %v1391_v34  ;;  %v709_v36 = vmul.f32 %v1391_v34, %v1391_v34  ;;  %1039 = vmatprep.subr.mxu1 %v752_v51 }
 0x1ce   : > { %1040 = vmatpush3.msra.mxu1 %v752_v51 }
 0x1cf   : > { %701 = vadd.xlane.f32.xlu1 %v700_v35  ;;  %v711_v38 = vadd.f32 %v710_v37, %v709_v36  ;;  %1041 = vmatprep.subr.mxu1 %v751_v52 }
 0x1d0   : > { %1042 = vmatpush3.msra.mxu1 %v751_v52 }
 0x1d1   : > { %1043 = vmatprep.subr.mxu1 %v750_v53 }
 0x1d2   : > { %1044 = vmatpush3.msra.mxu1 %v750_v53 }
 0x1d3   : > { %712 = vadd.xlane.f32.xlu1 %v711_v38  ;;  %1045 = vmatprep.subr.mxu1 %v749_v54 }
 0x1d4   : > { %1046 = vmatpush3.msra.mxu1 %v749_v54 }
 0x1d5   : > { %1047 = vmatprep.subr.mxu1 %v748_v55 }
 0x1d6   : > { %1048 = vmatpush3.msra.mxu1 %v748_v55 }
 0x258   : > { %v702_v56 = vpop.xlane.xlu1 %701 }
 0x259   : > { %v703_v57 = vrot.slane %v702_v56, 4 }
 0x25b   : > { %v704_v58 = vadd.f32 %v703_v57, %v702_v56 }
 0x25c   : > { %v713_v59 = vpop.xlane.xlu1 %712 }
 0x25d   : > { %v705_v60 = vrot.slane %v704_v58, 2  ;;  %v714_v61 = vrot.slane %v713_v59, 4 }
 0x25f   : > { %v706_v62 = vadd.f32 %v705_v60, %v704_v58  ;;  %v715_v63 = vadd.f32 %v714_v61, %v713_v59 }
 0x261   : > { %v707_v0 = vrot.slane %v706_v62, 1  ;;  %v716_v1 = vrot.slane %v715_v63, 2 }
 0x263   : > { %v708_v2 = vadd.f32 %v707_v0, %v706_v62  ;;  %v717_v3 = vadd.f32 %v716_v1, %v715_v63 }
 0x265   : > { %v720_v4 = vmul.f32 0.00048828125, %v708_v2  ;;  %v718_v5 = vrot.slane %v717_v3, 1 }
 0x267   : > { %v719_v7 = vadd.f32 %v718_v5, %v717_v3  ;;  %v722_v8 = vmul.f32 %v720_v4, %v720_v4 }
 0x269   : > { %v721_v9 = vmul.f32 0.00048828125, %v719_v7 }
 0x26b   : > { %v723_v11 = vsub.f32 %v721_v9, %v722_v8 }
 0x26d   : > { %v724_v12 = vmax.f32 %v723_v11, 0.0 }
 0x26f   : > { %v726_v13 = vadd.f32 1e-05, %v724_v12 }
 0x271   : > { %1106 = vrsqrt.f32 %v726_v13 }
 0x27e   : > { %v1107_v15 = vpop.eup %1106 }
 0x27f   : > { %v728_v16 = vmul.f32 %v1107_v15, %v725_v14 }
 0x281   : > { %v730_v18 = vmul.f32 %v728_v16, %v720_v4  ;;  %v736_v19 = vrot.slane %v728_v16, %v1375_v50 }
 0x283   : > { %v731_v20 = vsub.f32 %v729_v17, %v730_v18  ;;  %v738_v21 = vmul.f32 %v736_v19, %v1391_v34  ;;  %v739_v23 = vmul.f32 %v736_v19, %v1389_v33 }
 0x285   : > { %v744_v22 = vrot.slane %v731_v20, %v1375_v50 }
 0x287   : > { %v746_v24 = vadd.f32 %v744_v22, %v738_v21  ;;  %v747_v25 = vadd.f32 %v744_v22, %v739_v23 }
 0x289   : > { %1049 = vmatprep.mubr.f32.mxu1 %v746_v24 }
 0x28a   : > { %1050 = vmatmul.mubr.f32.vlgmr.msra.gmra.mxu1 %v747_v25 }
 0x34a   : > { %v1051_v27 = vpop.f32.mrf.mxu1 }
 0x34b   : > { %v843_v28 = vadd.f32 %v1051_v27, %v962_v26 }
 0x34c   : > { %v837_v29 = vpop.f32.mrf.mxu1 }
 0x34d   : > { %v847_v50 = vadd.f32 %v843_v28, %v1362_v10  ;;  %v838_v30 = vadd.f32 %v962_v26, %v837_v29 }
 0x34f   : > { %849 = vst.msk [vmem:[%s458_s20 + $0x8] sm:$0xff] %vm493_vm0, %v847_v50  ;;  %v846_v31 = vadd.f32 %v838_v30, %v1352_v6 }
 0x351   : > { %848 = vst.msk [vmem:[%s458_s20] sm:$0xff] %vm493_vm0, %v846_v31 }
 0x352   : > { %1136 = shalt.err (!%p1133_p2)
}
 0x353   : > { %s1137_s16 = scalar_lea.hbm %s1466_s24, 256  ;;  %s1141_s2 = scalar_lea.hbm %s1526_s13, 512 }
 0x354   : > { %p1138_p3 = scmp.ne.s32.totalorder %s1466_s24, %s1137_s16  ;;  %p1142_p8 = scmp.lt.s32.totalorder %s1466_s24, %s1526_s13 }
 0x355   : > { %p1143_p11 = scmp.lt.s32.totalorder %s1141_s2, %s1137_s16 }
 0x356   : > { %p1139_p4 = pnand %p1138_p3, %p1301_p5 }
 0x357   : > { %p1144_p9 = por %p1143_p11, %p1142_p8 }
 0x358   : > { %p1140_p7 = pneg %p1139_p4 }
 0x35a   : > { %p1145_p10 = pnand %p1144_p9, %p1140_p7 }
 0x35c   : > { %1148 = shalt.err (!%p1145_p10)
}
 0x35d   : > { %s1191_s30 = smov 128   ;;  %s1192_s15 = smov 8  }
 0x35e   : > { %1056 = dma.vmem_to_hbm [thread:$0]  (%p1301_p5), %s1468_s23, 256, %s1466_s24, %s1473_s29, %s1191_s30, %s1191_s30, %s1192_s15  }
 0x35f PF: > { %p1068_p12 = scmp.ge.s32.totalorder %s1187_s28, 2  ;;  %s879_s21 = sand.u32 1, %s1175_s25  }
 0x360   : > { %s880_s22 = scalar_lea.sflag [#allocation3], %s879_s21 }
 0x361   : > { %p1063_p13 = pnand %p1068_p12, %p1305_p6 }
 0x363   : > { %p1064_p0 = pneg %p1063_p13 }
 0x365   : > { %1170 = dma.done.wait (%p1064_p0), %s880_s22, 256  }
 0x366   : > { %1172 = vsyncadd (%p1064_p0), %s880_s22, 4294967040  ;;  %s1538_s28 = sld [smem:[#allocation9_spill]]  ;;  %s1541_s25 = smov %s1179_s26 }
 0x367   : > { %s1539_s16 = sld [smem:[#allocation8_spill]] }
 0x368   : > { %s1540_s27 = sld [smem:[#allocation10_spill]] }
 0x36c   : > { %p24_p1 = scmp.ge.s32.totalorder %s1538_s28, 4  }
 0x36d   : > { %s1542_s26 = smov %s1539_s16 }
 0x36e   :  { %26 = sbr.rel (!%p24_p1) target bundleno = 6 (0x6), region = 115 }
 0x373   :  { %885 = vsyncpa [#allocation3], 1 }
 0x374   :  { %887 = vsyncpa [#allocation3 + $0x1], 1 }
 0x375   :  { %888 = vsyncpa [#allocation4], 1 }
 0x376   :  { %890 = vsyncpa [#allocation4 + $0x1], 1 }

</bundles_post_ra>
